<compile_context>
chip_gen: v7x
topology: tpu7x:2x2x1
jax: 0.10.0
libtpu: 0.0.40
codegen_flags: <defaults>
</compile_context>

<pallas_src>
import jax
import jax.numpy as jnp
from jax.experimental import pallas as pl
from jax.experimental.pallas import tpu as pltpu

# ------------------------- small Mistral-like config -------------------------
VOCAB = 64
HIDDEN = 32
NUM_HEADS = 4
HEAD_DIM = 8            # NUM_HEADS * HEAD_DIM == HIDDEN
KV_HEADS = 2
INTERMEDIATE = 64
NUM_LAYERS = 2
EPS = 1e-6
ROPE_THETA = 10000.0
PAD_TOKEN_ID = 0

QW = NUM_HEADS * HEAD_DIM          # 32  query width
KW = KV_HEADS * HEAD_DIM           # 16  key/value width
QKV_WIDTH = 2 * QW + 2 * KW + KW   # 112 (q, q_rot, k, k_rot, v)
QKV_FUSED = 128                    # padded to one full lane tile
GU_FUSED = 2 * INTERMEDIATE        # 128 (gate | up)


# ----------------------------- fused mega-kernel -----------------------------
def _fused_mistral_kernel(x_ref, rope_ref, in_ln_ref, post_ln_ref,
                          wqkv_ref, wo_ref, wgu_ref, wd_ref, norm_ref, o_ref):
    BS, H = x_ref.shape
    S = rope_ref.shape[0]
    B = BS // S
    L = wqkv_ref.shape[0]
    NH, KV, D, I = NUM_HEADS, KV_HEADS, HEAD_DIM, INTERMEDIATE
    groups = NH // KV

    rope_mul = rope_ref[...]                               # (S, 128)

    # causal mask for the head-stacked (NH*S, S) score slab
    row = jax.lax.broadcasted_iota(jnp.int32, (NH * S, S), 0)
    col = jax.lax.broadcasted_iota(jnp.int32, (NH * S, S), 1)
    causal = col <= (row % S)
    neg = jnp.float32(-1e30)

    def rms(v, w):                                         # LigerRMSNorm, fp32 math
        var = jnp.mean(v * v, axis=-1, keepdims=True)
        return v * jax.lax.rsqrt(var + EPS) * w

    def mm(a, b):
        return jnp.dot(a, b, preferred_element_type=jnp.float32)

    # residual stream stays resident as ONE (B*S, H) slab across all layers
    hid = x_ref[...].astype(jnp.float32)

    for l in range(L):
        # ---- attention block: x + post_ln(attn(in_ln(x))[batch 0]) ----------
        # Only batch 0's attention result survives the reference `[0]` indexing,
        # so normalize/project batch 0's rows only (rows 0:S of the slab).
        xn0 = rms(hid[0:S, :], in_ln_ref[l])               # (S, H)

        # single lane-dense fused QKV matmul, RoPE (+ 1/sqrt(D)) as one multiply
        qkv = mm(xn0, wqkv_ref[l])                         # (S, 128)
        r = qkv * rope_mul
        q = r[:, 0:QW] + r[:, QW:2 * QW]                   # (S, 32) roped+scaled
        k = r[:, 2 * QW:2 * QW + KW] + r[:, 2 * QW + KW:2 * QW + 2 * KW]  # (S, 16)
        v = qkv[:, 2 * QW + 2 * KW:2 * QW + 2 * KW + KW]   # (S, 16)

        # per-head scores stacked into one slab -> one batched softmax
        s_all = jnp.concatenate(
            [jax.lax.dot_general(
                q[:, h * D:(h + 1) * D],
                k[:, (h // groups) * D:(h // groups + 1) * D],
                (((1,), (1,)), ((), ())),
                preferred_element_type=jnp.float32)
             for h in range(NH)], axis=0)                  # (NH*S, S)
        s_all = jnp.where(causal, s_all, neg)
        p_all = jnp.exp(s_all - jnp.max(s_all, axis=-1, keepdims=True))
        p_all = p_all / jnp.sum(p_all, axis=-1, keepdims=True)   # exact softmax

        # per-head PV, lane-concatenated, then ONE fused O-projection
        attn_cat = jnp.concatenate(
            [mm(p_all[h * S:(h + 1) * S, :],
                v[:, (h // groups) * D:(h // groups + 1) * D])
             for h in range(NH)], axis=-1)                 # (S, NH*D)
        attn0 = rms(mm(attn_cat, wo_ref[l]), post_ln_ref[l])     # (S, H)

        # residual add, broadcast over batch (reference quirk)
        hid = hid + jnp.concatenate([attn0] * B, axis=0)   # (B*S, H)

        # ---- mlp block: x + down(silu(gate(x)) * up(x)) (no pre-norm) -------
        gu = mm(hid, wgu_ref[l])                           # (B*S, 2I=128) lane-dense
        g = gu[:, :I]
        u = gu[:, I:]
        hid = hid + mm(g * jax.nn.sigmoid(g) * u, wd_ref[l])

    # ---- final model RMSNorm, single full-slab store -------------------------
    o_ref[...] = rms(hid, norm_ref[...]).astype(o_ref.dtype)


def _full_spec(shape):
    nd = len(shape)
    return pl.BlockSpec(shape, lambda i, _nd=nd: (0,) * _nd)


def mistral_forward(kp, input_ids):
    B, S = input_ids.shape
    # nn.Embedding lookup (gather) -- plain JAX glue; trivial at this vocab size.
    hidden = jnp.take(kp["embed"], input_ids, axis=0).reshape(B * S, HIDDEN)

    # position_ids = arange(S); lane-tiled RoPE multipliers matching the fused
    # QKV column layout [q | q_rot | k | k_rot | v | pad], 1/sqrt(D) folded into q.
    cos, sin = rope_cos_sin(S, HEAD_DIM, ROPE_THETA)       # (S, D) each
    scale = 1.0 / float(HEAD_DIM) ** 0.5
    rope_mul = jnp.concatenate([
        jnp.tile(cos, (1, NUM_HEADS)) * scale,             # q * cos * scale
        jnp.tile(sin, (1, NUM_HEADS)) * scale,             # q_rot * sin * scale
        jnp.tile(cos, (1, KV_HEADS)),                      # k * cos
        jnp.tile(sin, (1, KV_HEADS)),                      # k_rot * sin
        jnp.ones((S, KW), jnp.float32),                    # v passthrough
        jnp.zeros((S, QKV_FUSED - QKV_WIDTH), jnp.float32),
    ], axis=1)                                             # (S, 128)

    args = (hidden, rope_mul, kp["in_ln"], kp["post_ln"],
            kp["wqkv"], kp["wo"], kp["wgu"], kp["wd"], kp["norm"])
    out = pl.pallas_call(
        _fused_mistral_kernel,
        out_shape=jax.ShapeDtypeStruct((B * S, HIDDEN), hidden.dtype),
        grid=(1,),
        in_specs=[_full_spec(a.shape) for a in args],
        out_specs=_full_spec((B * S, HIDDEN)),
        compiler_params=pltpu.CompilerParams(dimension_semantics=("arbitrary",)),
    )(*args)
    return out.reshape(B, S, HIDDEN)


# ------------------------------- JAX glue -------------------------------------
def rope_cos_sin(seq_len, dim, base):
    inv_freq = 1.0 / (base ** (jnp.arange(0, dim, 2, dtype=jnp.float32) / dim))
    pos = jnp.arange(seq_len, dtype=jnp.float32)
    freqs = pos[:, None] * inv_freq[None, :]               # (S, dim/2)
    emb = jnp.concatenate([freqs, freqs], axis=-1)         # (S, dim)
    return jnp.cos(emb), jnp.sin(emb)


def prepare_params(params):
    """One-time repack of PyTorch-layout (out,in) weights into fused kernel layout."""
    L, H, D, NH, KV, I = NUM_LAYERS, HIDDEN, HEAD_DIM, NUM_HEADS, KV_HEADS, INTERMEDIATE
    half = D // 2
    idx = jnp.arange(half)
    # rotate_half(x) == x @ P with P a signed permutation; folding P into the
    # projection weight turns RoPE into elementwise cos/sin scaling of the
    # fused QKV matmul output.
    P = jnp.zeros((D, D), jnp.float32)
    P = P.at[half + idx, idx].set(-1.0)
    P = P.at[idx, half + idx].set(1.0)

    def rot(w_io, n):                    # (H, n*D) -> per-head rotate_half folded
        return (w_io.reshape(H, n, D) @ P).reshape(H, n * D)

    def fuse_qkv(p):
        wq = p["wq"].T                   # (H, NH*D)
        wk = p["wk"].T                   # (H, KV*D)
        wv = p["wv"].T                   # (H, KV*D)
        pad = jnp.zeros((H, QKV_FUSED - QKV_WIDTH), jnp.float32)
        return jnp.concatenate([wq, rot(wq, NH), wk, rot(wk, KV), wv, pad], axis=1)

    layers = params["layers"]
    return dict(
        embed=params["embed"],
        in_ln=jnp.stack([p["in_ln"] for p in layers]).reshape(L, 1, H),
        post_ln=jnp.stack([p["post_ln"] for p in layers]).reshape(L, 1, H),
        wqkv=jnp.stack([fuse_qkv(p) for p in layers]),                      # (L, H, 128)
        wo=jnp.stack([p["wo"].T for p in layers]),                          # (L, NH*D, H)
        wgu=jnp.stack([jnp.concatenate([p["wg"].T, p["wu"].T], axis=1)
                       for p in layers]),                                   # (L, H, 2I)
        wd=jnp.stack([p["wd"].T for p in layers]),                          # (L, I, H)
        norm=params["norm"].reshape(1, H),
    )


def reference_forward(params, input_ids):
    """Pure-JAX transcription of the PyTorch module (numerical check only)."""
    B, S = input_ids.shape
    x = jnp.take(params["embed"], input_ids, axis=0)
    cos, sin = rope_cos_sin(S, HEAD_DIM, ROPE_THETA)
    groups = NUM_HEADS // KV_HEADS

    def rms(v, w):
        var = jnp.mean(v * v, axis=-1, keepdims=True)
        return v * jax.lax.rsqrt(var + EPS) * w

    def rope(t):                                  # (B, nh, S, D)
        d2 = t.shape[-1] // 2
        rot = jnp.concatenate([-t[..., d2:], t[..., :d2]], axis=-1)
        return t * cos[None, None] + rot * sin[None, None]

    for p in params["layers"]:
        xn = rms(x, p["in_ln"])
        q = (xn @ p["wq"].T).reshape(B, S, NUM_HEADS, HEAD_DIM)
        k = (xn @ p["wk"].T).reshape(B, S, KV_HEADS, HEAD_DIM)
        v = (xn @ p["wv"].T).reshape(B, S, KV_HEADS, HEAD_DIM)
        k = jnp.repeat(k, groups, axis=2)
        v = jnp.repeat(v, groups, axis=2)
        q, k, v = [t.transpose(0, 2, 1, 3) for t in (q, k, v)]
        q, k = rope(q), rope(k)
        s = jnp.einsum("bhqd,bhkd->bhqk", q, k) / float(HEAD_DIM) ** 0.5
        s = jnp.where(jnp.tril(jnp.ones((S, S), bool)), s, -jnp.inf)
        attn = jnp.einsum("bhqk,bhkd->bhqd", jax.nn.softmax(s, axis=-1), v)
        attn = attn.transpose(0, 2, 1, 3).reshape(B, S, -1) @ p["wo"].T
        x = x + rms(attn[0], p["post_ln"])[None]   # reference quirk: batch 0 only
        g = x @ p["wg"].T
        u = x @ p["wu"].T
        x = x + (g * jax.nn.sigmoid(g) * u) @ p["wd"].T
    return rms(x, params["norm"])


# TODO(synk): OffloadCheckpointer is a training-time activation-offload rematerializer;
# forward semantics are identical to calling the wrapped function directly (done above).

def init_params(key):
    def w(k, shape, scale=0.02):
        return scale * jax.random.normal(k, shape, jnp.float32)

    keys = iter(jax.random.split(key, 1 + 7 * NUM_LAYERS))
    embed = w(next(keys), (VOCAB, HIDDEN))
    embed = embed.at[PAD_TOKEN_ID].set(0.0)   # nn.Embedding(padding_idx=pad_token_id)
    layers = []
    for _ in range(NUM_LAYERS):
        layers.append(dict(
            in_ln=jnp.ones((HIDDEN,), jnp.float32),
            post_ln=jnp.ones((HIDDEN,), jnp.float32),
            wq=w(next(keys), (NUM_HEADS * HEAD_DIM, HIDDEN)),
            wk=w(next(keys), (KV_HEADS * HEAD_DIM, HIDDEN)),
            wv=w(next(keys), (KV_HEADS * HEAD_DIM, HIDDEN)),
            wo=w(next(keys), (HIDDEN, NUM_HEADS * HEAD_DIM)),
            wg=w(next(keys), (INTERMEDIATE, HIDDEN)),
            wu=w(next(keys), (INTERMEDIATE, HIDDEN)),
            wd=w(next(keys), (HIDDEN, INTERMEDIATE)),
        ))
    return dict(embed=embed, layers=layers, norm=jnp.ones((HIDDEN,), jnp.float32))


if __name__ == "__main__":
    root = jax.random.PRNGKey(0)
    pkey, ikey = jax.random.split(root)
    params = init_params(pkey)                 # PyTorch-style (out, in) weights
    kparams = prepare_params(params)           # one-time repack into fused layouts

    B, S = 2, 8
    input_ids = jax.random.randint(ikey, (B, S), 0, VOCAB, dtype=jnp.int32)

    out = jax.jit(mistral_forward)(kparams, input_ids)
    out = jax.block_until_ready(out)
    assert out.shape == (B, S, HIDDEN), out.shape
    assert bool(jnp.all(jnp.isfinite(out)))

    # correctness check vs. pure-JAX reference (exact softmax, all-f32 -> tight tol)
    ref = reference_forward(params, input_ids)
    err = float(jnp.max(jnp.abs(out - ref)))
    assert err < 1e-3, f"max abs error vs reference: {err}"

    print("KERNEL_OK")
</pallas_src>

<mosaic_0001>
module attributes {stable_mosaic.version = 11 : i64} {
  func.func @_fused_mistral_kernel(%arg0: i32, %arg1: memref<16x32xf32, #tpu.memory_space<vmem>>, %arg2: memref<8x128xf32, #tpu.memory_space<vmem>>, %arg3: memref<2x1x32xf32, #tpu.memory_space<vmem>>, %arg4: memref<2x1x32xf32, #tpu.memory_space<vmem>>, %arg5: memref<2x32x128xf32, #tpu.memory_space<vmem>>, %arg6: memref<2x32x32xf32, #tpu.memory_space<vmem>>, %arg7: memref<2x32x128xf32, #tpu.memory_space<vmem>>, %arg8: memref<2x64x32xf32, #tpu.memory_space<vmem>>, %arg9: memref<1x32xf32, #tpu.memory_space<vmem>>, %arg10: memref<16x32xf32, #tpu.memory_space<vmem>>) attributes {dimension_semantics = [#tpu.dimension_semantics<arbitrary>], iteration_bounds = array<i64: 1>, scalar_prefetch = 0 : i64, scratch_operands = 0 : i64, tpu.core_type = #tpu.core_type<tc>, window_params = [{pipeline_mode = #tpu.pipeline_mode<synchronous>, transform_indices = @transform_0, window_bounds = array<i64: 16, 32>}, {pipeline_mode = #tpu.pipeline_mode<synchronous>, transform_indices = @transform_1, window_bounds = array<i64: 8, 128>}, {pipeline_mode = #tpu.pipeline_mode<synchronous>, transform_indices = @transform_2, window_bounds = array<i64: 2, 1, 32>}, {pipeline_mode = #tpu.pipeline_mode<synchronous>, transform_indices = @transform_3, window_bounds = array<i64: 2, 1, 32>}, {pipeline_mode = #tpu.pipeline_mode<synchronous>, transform_indices = @transform_4, window_bounds = array<i64: 2, 32, 128>}, {pipeline_mode = #tpu.pipeline_mode<synchronous>, transform_indices = @transform_5, window_bounds = array<i64: 2, 32, 32>}, {pipeline_mode = #tpu.pipeline_mode<synchronous>, transform_indices = @transform_6, window_bounds = array<i64: 2, 32, 128>}, {pipeline_mode = #tpu.pipeline_mode<synchronous>, transform_indices = @transform_7, window_bounds = array<i64: 2, 64, 32>}, {pipeline_mode = #tpu.pipeline_mode<synchronous>, transform_indices = @transform_8, window_bounds = array<i64: 1, 32>}, {pipeline_mode = #tpu.pipeline_mode<synchronous>, transform_indices = @transform_9, window_bounds = array<i64: 16, 32>}]} {
    %c0 = arith.constant 0 : index
    %c0_0 = arith.constant 0 : index
    %0 = vector.load %arg2[%c0, %c0_0] : memref<8x128xf32, #tpu.memory_space<vmem>>, vector<8x128xf32>
    %1 = tpu.iota {dimensions = array<i32: 0>} : vector<32x8xi32>
    %2 = tpu.iota {dimensions = array<i32: 1>} : vector<32x8xi32>
    %c8_i32 = arith.constant 8 : i32
    %c0_i32 = arith.constant 0 : i32
    %3 = arith.cmpi eq, %c8_i32, %c0_i32 : i32
    %c1_i32 = arith.constant 1 : i32
    %4 = arith.select %3, %c1_i32, %c8_i32 : i32
    %5 = vector.broadcast %4 : i32 to vector<32x8xi32>
    %6 = arith.remsi %1, %5 : vector<32x8xi32>
    %c0_i32_1 = arith.constant 0 : i32
    %7 = vector.broadcast %c0_i32_1 : i32 to vector<32x8xi32>
    %8 = arith.cmpi ne, %6, %7 : vector<32x8xi32>
    %c0_i32_2 = arith.constant 0 : i32
    %9 = vector.broadcast %c0_i32_2 : i32 to vector<32x8xi32>
    %10 = arith.cmpi slt, %6, %9 : vector<32x8xi32>
    %c0_i32_3 = arith.constant 0 : i32
    %11 = arith.cmpi slt, %4, %c0_i32_3 : i32
    %12 = vector.broadcast %11 : i1 to vector<32x8xi1>
    %13 = vector.broadcast %12 : vector<32x8xi1> to vector<32x8xi1>
    %14 = arith.xori %10, %13 : vector<32x8xi1>
    %15 = arith.andi %14, %8 : vector<32x8xi1>
    %16 = vector.broadcast %4 : i32 to vector<32x8xi32>
    %17 = arith.addi %6, %16 : vector<32x8xi32>
    %18 = arith.select %15, %17, %6 : vector<32x8xi1>, vector<32x8xi32>
    %19 = arith.cmpi sle, %2, %18 : vector<32x8xi32>
    %c0_4 = arith.constant 0 : index
    %c0_5 = arith.constant 0 : index
    %20 = vector.load %arg1[%c0_4, %c0_5] : memref<16x32xf32, #tpu.memory_space<vmem>>, vector<16x32xf32>
    %21 = vector.extract_strided_slice %20 {offsets = [0, 0], sizes = [8, 32], strides = [1, 1]} : vector<16x32xf32> to vector<8x32xf32>
    %c0_6 = arith.constant 0 : index
    %c0_7 = arith.constant 0 : index
    %c0_8 = arith.constant 0 : index
    %22 = vector.load %arg3[%c0_6, %c0_7, %c0_8] : memref<2x1x32xf32, #tpu.memory_space<vmem>>, vector<1x1x32xf32>
    %23 = vector.shape_cast %22 : vector<1x1x32xf32> to vector<1x32xf32>
    %24 = arith.mulf %21, %21 : vector<8x32xf32>
    %cst = arith.constant dense<0.000000e+00> : vector<8xf32>
    %25 = vector.multi_reduction <add>, %24, %cst [1] : vector<8x32xf32> to vector<8xf32>
    %26 = vector.shape_cast %25 : vector<8xf32> to vector<8x1xf32>
    %cst_9 = arith.constant 3.200000e+01 : f32
    %27 = vector.broadcast %cst_9 : f32 to vector<8x1xf32>
    %28 = arith.divf %26, %27 : vector<8x1xf32>
    %cst_10 = arith.constant 9.99999997E-7 : f32
    %29 = vector.broadcast %cst_10 : f32 to vector<8x1xf32>
    %30 = arith.addf %28, %29 : vector<8x1xf32>
    %31 = math.rsqrt %30 : vector<8x1xf32>
    %32 = vector.broadcast %31 : vector<8x1xf32> to vector<8x32xf32>
    %33 = arith.mulf %21, %32 : vector<8x32xf32>
    %34 = vector.broadcast %23 : vector<1x32xf32> to vector<8x32xf32>
    %35 = arith.mulf %33, %34 : vector<8x32xf32>
    %c0_11 = arith.constant 0 : index
    %c0_12 = arith.constant 0 : index
    %c0_13 = arith.constant 0 : index
    %36 = vector.load %arg5[%c0_11, %c0_12, %c0_13] : memref<2x32x128xf32, #tpu.memory_space<vmem>>, vector<1x32x128xf32>
    %37 = vector.shape_cast %36 : vector<1x32x128xf32> to vector<32x128xf32>
    %cst_14 = arith.constant dense<0.000000e+00> : vector<8x128xf32>
    %38 = tpu.matmul %35, %37, %cst_14 {dimension_numbers = #tpu.dot_dimension_numbers<[1], [0], [0], [1], [0, 0, 1, 1], [], []>} : vector<8x32xf32>, vector<32x128xf32>, vector<8x128xf32> -> vector<8x128xf32>
    %39 = arith.mulf %38, %0 : vector<8x128xf32>
    %40 = vector.extract_strided_slice %39 {offsets = [0, 0], sizes = [8, 32], strides = [1, 1]} : vector<8x128xf32> to vector<8x32xf32>
    %41 = vector.extract_strided_slice %39 {offsets = [0, 32], sizes = [8, 32], strides = [1, 1]} : vector<8x128xf32> to vector<8x32xf32>
    %42 = arith.addf %40, %41 : vector<8x32xf32>
    %43 = vector.extract_strided_slice %39 {offsets = [0, 64], sizes = [8, 16], strides = [1, 1]} : vector<8x128xf32> to vector<8x16xf32>
    %44 = vector.extract_strided_slice %39 {offsets = [0, 80], sizes = [8, 16], strides = [1, 1]} : vector<8x128xf32> to vector<8x16xf32>
    %45 = arith.addf %43, %44 : vector<8x16xf32>
    %46 = vector.extract_strided_slice %38 {offsets = [0, 96], sizes = [8, 16], strides = [1, 1]} : vector<8x128xf32> to vector<8x16xf32>
    %47 = vector.extract_strided_slice %42 {offsets = [0, 0], sizes = [8, 8], strides = [1, 1]} : vector<8x32xf32> to vector<8x8xf32>
    %48 = vector.extract_strided_slice %45 {offsets = [0, 0], sizes = [8, 8], strides = [1, 1]} : vector<8x16xf32> to vector<8x8xf32>
    %cst_15 = arith.constant dense<0.000000e+00> : vector<8x8xf32>
    %49 = tpu.matmul %47, %48, %cst_15 {dimension_numbers = #tpu.dot_dimension_numbers<[1], [1], [0], [0], [0, 0, 1, 0], [], []>} : vector<8x8xf32>, vector<8x8xf32>, vector<8x8xf32> -> vector<8x8xf32>
    %50 = vector.extract_strided_slice %42 {offsets = [0, 8], sizes = [8, 8], strides = [1, 1]} : vector<8x32xf32> to vector<8x8xf32>
    %51 = vector.extract_strided_slice %45 {offsets = [0, 0], sizes = [8, 8], strides = [1, 1]} : vector<8x16xf32> to vector<8x8xf32>
    %cst_16 = arith.constant dense<0.000000e+00> : vector<8x8xf32>
    %52 = tpu.matmul %50, %51, %cst_16 {dimension_numbers = #tpu.dot_dimension_numbers<[1], [1], [0], [0], [0, 0, 1, 0], [], []>} : vector<8x8xf32>, vector<8x8xf32>, vector<8x8xf32> -> vector<8x8xf32>
    %53 = vector.extract_strided_slice %42 {offsets = [0, 16], sizes = [8, 8], strides = [1, 1]} : vector<8x32xf32> to vector<8x8xf32>
    %54 = vector.extract_strided_slice %45 {offsets = [0, 8], sizes = [8, 8], strides = [1, 1]} : vector<8x16xf32> to vector<8x8xf32>
    %cst_17 = arith.constant dense<0.000000e+00> : vector<8x8xf32>
    %55 = tpu.matmul %53, %54, %cst_17 {dimension_numbers = #tpu.dot_dimension_numbers<[1], [1], [0], [0], [0, 0, 1, 0], [], []>} : vector<8x8xf32>, vector<8x8xf32>, vector<8x8xf32> -> vector<8x8xf32>
    %56 = vector.extract_strided_slice %42 {offsets = [0, 24], sizes = [8, 8], strides = [1, 1]} : vector<8x32xf32> to vector<8x8xf32>
    %57 = vector.extract_strided_slice %45 {offsets = [0, 8], sizes = [8, 8], strides = [1, 1]} : vector<8x16xf32> to vector<8x8xf32>
    %cst_18 = arith.constant dense<0.000000e+00> : vector<8x8xf32>
    %58 = tpu.matmul %56, %57, %cst_18 {dimension_numbers = #tpu.dot_dimension_numbers<[1], [1], [0], [0], [0, 0, 1, 0], [], []>} : vector<8x8xf32>, vector<8x8xf32>, vector<8x8xf32> -> vector<8x8xf32>
    %59 = tpu.concatenate %49, %52, %55, %58 in 0 : vector<8x8xf32>, vector<8x8xf32>, vector<8x8xf32>, vector<8x8xf32> -> vector<32x8xf32>
    %cst_19 = arith.constant -1.000000e+30 : f32
    %60 = vector.broadcast %cst_19 : f32 to vector<32x8xf32>
    %61 = arith.select %19, %59, %60 : vector<32x8xi1>, vector<32x8xf32>
    %cst_20 = arith.constant dense<0xFF800000> : vector<32xf32>
    %62 = vector.multi_reduction <maximumf>, %61, %cst_20 [1] : vector<32x8xf32> to vector<32xf32>
    %63 = vector.shape_cast %62 : vector<32xf32> to vector<32x1xf32>
    %64 = vector.broadcast %63 : vector<32x1xf32> to vector<32x8xf32>
    %65 = arith.subf %61, %64 : vector<32x8xf32>
    %66 = math.exp %65 : vector<32x8xf32>
    %cst_21 = arith.constant dense<0.000000e+00> : vector<32xf32>
    %67 = vector.multi_reduction <add>, %66, %cst_21 [1] : vector<32x8xf32> to vector<32xf32>
    %68 = vector.shape_cast %67 : vector<32xf32> to vector<32x1xf32>
    %69 = vector.broadcast %68 : vector<32x1xf32> to vector<32x8xf32>
    %70 = arith.divf %66, %69 : vector<32x8xf32>
    %71 = vector.extract_strided_slice %70 {offsets = [0, 0], sizes = [8, 8], strides = [1, 1]} : vector<32x8xf32> to vector<8x8xf32>
    %72 = vector.extract_strided_slice %46 {offsets = [0, 0], sizes = [8, 8], strides = [1, 1]} : vector<8x16xf32> to vector<8x8xf32>
    %cst_22 = arith.constant dense<0.000000e+00> : vector<8x8xf32>
    %73 = tpu.matmul %71, %72, %cst_22 {dimension_numbers = #tpu.dot_dimension_numbers<[1], [0], [0], [1], [0, 0, 1, 1], [], []>} : vector<8x8xf32>, vector<8x8xf32>, vector<8x8xf32> -> vector<8x8xf32>
    %74 = vector.extract_strided_slice %70 {offsets = [8, 0], sizes = [8, 8], strides = [1, 1]} : vector<32x8xf32> to vector<8x8xf32>
    %75 = vector.extract_strided_slice %46 {offsets = [0, 0], sizes = [8, 8], strides = [1, 1]} : vector<8x16xf32> to vector<8x8xf32>
    %cst_23 = arith.constant dense<0.000000e+00> : vector<8x8xf32>
    %76 = tpu.matmul %74, %75, %cst_23 {dimension_numbers = #tpu.dot_dimension_numbers<[1], [0], [0], [1], [0, 0, 1, 1], [], []>} : vector<8x8xf32>, vector<8x8xf32>, vector<8x8xf32> -> vector<8x8xf32>
    %77 = vector.extract_strided_slice %70 {offsets = [16, 0], sizes = [8, 8], strides = [1, 1]} : vector<32x8xf32> to vector<8x8xf32>
    %78 = vector.extract_strided_slice %46 {offsets = [0, 8], sizes = [8, 8], strides = [1, 1]} : vector<8x16xf32> to vector<8x8xf32>
    %cst_24 = arith.constant dense<0.000000e+00> : vector<8x8xf32>
    %79 = tpu.matmul %77, %78, %cst_24 {dimension_numbers = #tpu.dot_dimension_numbers<[1], [0], [0], [1], [0, 0, 1, 1], [], []>} : vector<8x8xf32>, vector<8x8xf32>, vector<8x8xf32> -> vector<8x8xf32>
    %80 = vector.extract_strided_slice %70 {offsets = [24, 0], sizes = [8, 8], strides = [1, 1]} : vector<32x8xf32> to vector<8x8xf32>
    %81 = vector.extract_strided_slice %46 {offsets = [0, 8], sizes = [8, 8], strides = [1, 1]} : vector<8x16xf32> to vector<8x8xf32>
    %cst_25 = arith.constant dense<0.000000e+00> : vector<8x8xf32>
    %82 = tpu.matmul %80, %81, %cst_25 {dimension_numbers = #tpu.dot_dimension_numbers<[1], [0], [0], [1], [0, 0, 1, 1], [], []>} : vector<8x8xf32>, vector<8x8xf32>, vector<8x8xf32> -> vector<8x8xf32>
    %83 = tpu.concatenate %73, %76, %79, %82 in 1 : vector<8x8xf32>, vector<8x8xf32>, vector<8x8xf32>, vector<8x8xf32> -> vector<8x32xf32>
    %c0_26 = arith.constant 0 : index
    %c0_27 = arith.constant 0 : index
    %c0_28 = arith.constant 0 : index
    %84 = vector.load %arg6[%c0_26, %c0_27, %c0_28] : memref<2x32x32xf32, #tpu.memory_space<vmem>>, vector<1x32x32xf32>
    %85 = vector.shape_cast %84 : vector<1x32x32xf32> to vector<32x32xf32>
    %cst_29 = arith.constant dense<0.000000e+00> : vector<8x32xf32>
    %86 = tpu.matmul %83, %85, %cst_29 {dimension_numbers = #tpu.dot_dimension_numbers<[1], [0], [0], [1], [0, 0, 1, 1], [], []>} : vector<8x32xf32>, vector<32x32xf32>, vector<8x32xf32> -> vector<8x32xf32>
    %c0_30 = arith.constant 0 : index
    %c0_31 = arith.constant 0 : index
    %c0_32 = arith.constant 0 : index
    %87 = vector.load %arg4[%c0_30, %c0_31, %c0_32] : memref<2x1x32xf32, #tpu.memory_space<vmem>>, vector<1x1x32xf32>
    %88 = vector.shape_cast %87 : vector<1x1x32xf32> to vector<1x32xf32>
    %89 = arith.mulf %86, %86 : vector<8x32xf32>
    %cst_33 = arith.constant dense<0.000000e+00> : vector<8xf32>
    %90 = vector.multi_reduction <add>, %89, %cst_33 [1] : vector<8x32xf32> to vector<8xf32>
    %91 = vector.shape_cast %90 : vector<8xf32> to vector<8x1xf32>
    %cst_34 = arith.constant 3.200000e+01 : f32
    %92 = vector.broadcast %cst_34 : f32 to vector<8x1xf32>
    %93 = arith.divf %91, %92 : vector<8x1xf32>
    %cst_35 = arith.constant 9.99999997E-7 : f32
    %94 = vector.broadcast %cst_35 : f32 to vector<8x1xf32>
    %95 = arith.addf %93, %94 : vector<8x1xf32>
    %96 = math.rsqrt %95 : vector<8x1xf32>
    %97 = vector.broadcast %96 : vector<8x1xf32> to vector<8x32xf32>
    %98 = arith.mulf %86, %97 : vector<8x32xf32>
    %99 = vector.broadcast %88 : vector<1x32xf32> to vector<8x32xf32>
    %100 = arith.mulf %98, %99 : vector<8x32xf32>
    %101 = tpu.concatenate %100, %100 in 0 : vector<8x32xf32>, vector<8x32xf32> -> vector<16x32xf32>
    %102 = arith.addf %20, %101 : vector<16x32xf32>
    %c0_36 = arith.constant 0 : index
    %c0_37 = arith.constant 0 : index
    %c0_38 = arith.constant 0 : index
    %103 = vector.load %arg7[%c0_36, %c0_37, %c0_38] : memref<2x32x128xf32, #tpu.memory_space<vmem>>, vector<1x32x128xf32>
    %104 = vector.shape_cast %103 : vector<1x32x128xf32> to vector<32x128xf32>
    %cst_39 = arith.constant dense<0.000000e+00> : vector<16x128xf32>
    %105 = tpu.matmul %102, %104, %cst_39 {dimension_numbers = #tpu.dot_dimension_numbers<[1], [0], [0], [1], [0, 0, 1, 1], [], []>} : vector<16x32xf32>, vector<32x128xf32>, vector<16x128xf32> -> vector<16x128xf32>
    %106 = vector.extract_strided_slice %105 {offsets = [0, 0], sizes = [16, 64], strides = [1, 1]} : vector<16x128xf32> to vector<16x64xf32>
    %107 = vector.extract_strided_slice %105 {offsets = [0, 64], sizes = [16, 64], strides = [1, 1]} : vector<16x128xf32> to vector<16x64xf32>
    %108 = arith.negf %106 : vector<16x64xf32>
    %109 = math.exp %108 : vector<16x64xf32>
    %cst_40 = arith.constant 1.000000e+00 : f32
    %110 = vector.broadcast %cst_40 : f32 to vector<16x64xf32>
    %111 = arith.addf %110, %109 : vector<16x64xf32>
    %112 = arith.divf %110, %111 : vector<16x64xf32>
    %113 = arith.mulf %106, %112 : vector<16x64xf32>
    %114 = arith.mulf %113, %107 : vector<16x64xf32>
    %c0_41 = arith.constant 0 : index
    %c0_42 = arith.constant 0 : index
    %c0_43 = arith.constant 0 : index
    %115 = vector.load %arg8[%c0_41, %c0_42, %c0_43] : memref<2x64x32xf32, #tpu.memory_space<vmem>>, vector<1x64x32xf32>
    %116 = vector.shape_cast %115 : vector<1x64x32xf32> to vector<64x32xf32>
    %cst_44 = arith.constant dense<0.000000e+00> : vector<16x32xf32>
    %117 = tpu.matmul %114, %116, %cst_44 {dimension_numbers = #tpu.dot_dimension_numbers<[1], [0], [0], [1], [0, 0, 1, 1], [], []>} : vector<16x64xf32>, vector<64x32xf32>, vector<16x32xf32> -> vector<16x32xf32>
    %118 = arith.addf %102, %117 : vector<16x32xf32>
    %119 = vector.extract_strided_slice %118 {offsets = [0, 0], sizes = [8, 32], strides = [1, 1]} : vector<16x32xf32> to vector<8x32xf32>
    %c1 = arith.constant 1 : index
    %c0_45 = arith.constant 0 : index
    %c0_46 = arith.constant 0 : index
    %120 = vector.load %arg3[%c1, %c0_45, %c0_46] : memref<2x1x32xf32, #tpu.memory_space<vmem>>, vector<1x1x32xf32>
    %121 = vector.shape_cast %120 : vector<1x1x32xf32> to vector<1x32xf32>
    %122 = arith.mulf %119, %119 : vector<8x32xf32>
    %cst_47 = arith.constant dense<0.000000e+00> : vector<8xf32>
    %123 = vector.multi_reduction <add>, %122, %cst_47 [1] : vector<8x32xf32> to vector<8xf32>
    %124 = vector.shape_cast %123 : vector<8xf32> to vector<8x1xf32>
    %cst_48 = arith.constant 3.200000e+01 : f32
    %125 = vector.broadcast %cst_48 : f32 to vector<8x1xf32>
    %126 = arith.divf %124, %125 : vector<8x1xf32>
    %cst_49 = arith.constant 9.99999997E-7 : f32
    %127 = vector.broadcast %cst_49 : f32 to vector<8x1xf32>
    %128 = arith.addf %126, %127 : vector<8x1xf32>
    %129 = math.rsqrt %128 : vector<8x1xf32>
    %130 = vector.broadcast %129 : vector<8x1xf32> to vector<8x32xf32>
    %131 = arith.mulf %119, %130 : vector<8x32xf32>
    %132 = vector.broadcast %121 : vector<1x32xf32> to vector<8x32xf32>
    %133 = arith.mulf %131, %132 : vector<8x32xf32>
    %c1_50 = arith.constant 1 : index
    %c0_51 = arith.constant 0 : index
    %c0_52 = arith.constant 0 : index
    %134 = vector.load %arg5[%c1_50, %c0_51, %c0_52] : memref<2x32x128xf32, #tpu.memory_space<vmem>>, vector<1x32x128xf32>
    %135 = vector.shape_cast %134 : vector<1x32x128xf32> to vector<32x128xf32>
    %cst_53 = arith.constant dense<0.000000e+00> : vector<8x128xf32>
    %136 = tpu.matmul %133, %135, %cst_53 {dimension_numbers = #tpu.dot_dimension_numbers<[1], [0], [0], [1], [0, 0, 1, 1], [], []>} : vector<8x32xf32>, vector<32x128xf32>, vector<8x128xf32> -> vector<8x128xf32>
    %137 = arith.mulf %136, %0 : vector<8x128xf32>
    %138 = vector.extract_strided_slice %137 {offsets = [0, 0], sizes = [8, 32], strides = [1, 1]} : vector<8x128xf32> to vector<8x32xf32>
    %139 = vector.extract_strided_slice %137 {offsets = [0, 32], sizes = [8, 32], strides = [1, 1]} : vector<8x128xf32> to vector<8x32xf32>
    %140 = arith.addf %138, %139 : vector<8x32xf32>
    %141 = vector.extract_strided_slice %137 {offsets = [0, 64], sizes = [8, 16], strides = [1, 1]} : vector<8x128xf32> to vector<8x16xf32>
    %142 = vector.extract_strided_slice %137 {offsets = [0, 80], sizes = [8, 16], strides = [1, 1]} : vector<8x128xf32> to vector<8x16xf32>
    %143 = arith.addf %141, %142 : vector<8x16xf32>
    %144 = vector.extract_strided_slice %136 {offsets = [0, 96], sizes = [8, 16], strides = [1, 1]} : vector<8x128xf32> to vector<8x16xf32>
    %145 = vector.extract_strided_slice %140 {offsets = [0, 0], sizes = [8, 8], strides = [1, 1]} : vector<8x32xf32> to vector<8x8xf32>
    %146 = vector.extract_strided_slice %143 {offsets = [0, 0], sizes = [8, 8], strides = [1, 1]} : vector<8x16xf32> to vector<8x8xf32>
    %cst_54 = arith.constant dense<0.000000e+00> : vector<8x8xf32>
    %147 = tpu.matmul %145, %146, %cst_54 {dimension_numbers = #tpu.dot_dimension_numbers<[1], [1], [0], [0], [0, 0, 1, 0], [], []>} : vector<8x8xf32>, vector<8x8xf32>, vector<8x8xf32> -> vector<8x8xf32>
    %148 = vector.extract_strided_slice %140 {offsets = [0, 8], sizes = [8, 8], strides = [1, 1]} : vector<8x32xf32> to vector<8x8xf32>
    %149 = vector.extract_strided_slice %143 {offsets = [0, 0], sizes = [8, 8], strides = [1, 1]} : vector<8x16xf32> to vector<8x8xf32>
    %cst_55 = arith.constant dense<0.000000e+00> : vector<8x8xf32>
    %150 = tpu.matmul %148, %149, %cst_55 {dimension_numbers = #tpu.dot_dimension_numbers<[1], [1], [0], [0], [0, 0, 1, 0], [], []>} : vector<8x8xf32>, vector<8x8xf32>, vector<8x8xf32> -> vector<8x8xf32>
    %151 = vector.extract_strided_slice %140 {offsets = [0, 16], sizes = [8, 8], strides = [1, 1]} : vector<8x32xf32> to vector<8x8xf32>
    %152 = vector.extract_strided_slice %143 {offsets = [0, 8], sizes = [8, 8], strides = [1, 1]} : vector<8x16xf32> to vector<8x8xf32>
    %cst_56 = arith.constant dense<0.000000e+00> : vector<8x8xf32>
    %153 = tpu.matmul %151, %152, %cst_56 {dimension_numbers = #tpu.dot_dimension_numbers<[1], [1], [0], [0], [0, 0, 1, 0], [], []>} : vector<8x8xf32>, vector<8x8xf32>, vector<8x8xf32> -> vector<8x8xf32>
    %154 = vector.extract_strided_slice %140 {offsets = [0, 24], sizes = [8, 8], strides = [1, 1]} : vector<8x32xf32> to vector<8x8xf32>
    %155 = vector.extract_strided_slice %143 {offsets = [0, 8], sizes = [8, 8], strides = [1, 1]} : vector<8x16xf32> to vector<8x8xf32>
    %cst_57 = arith.constant dense<0.000000e+00> : vector<8x8xf32>
    %156 = tpu.matmul %154, %155, %cst_57 {dimension_numbers = #tpu.dot_dimension_numbers<[1], [1], [0], [0], [0, 0, 1, 0], [], []>} : vector<8x8xf32>, vector<8x8xf32>, vector<8x8xf32> -> vector<8x8xf32>
    %157 = tpu.concatenate %147, %150, %153, %156 in 0 : vector<8x8xf32>, vector<8x8xf32>, vector<8x8xf32>, vector<8x8xf32> -> vector<32x8xf32>
    %cst_58 = arith.constant -1.000000e+30 : f32
    %158 = vector.broadcast %cst_58 : f32 to vector<32x8xf32>
    %159 = arith.select %19, %157, %158 : vector<32x8xi1>, vector<32x8xf32>
    %cst_59 = arith.constant dense<0xFF800000> : vector<32xf32>
    %160 = vector.multi_reduction <maximumf>, %159, %cst_59 [1] : vector<32x8xf32> to vector<32xf32>
    %161 = vector.shape_cast %160 : vector<32xf32> to vector<32x1xf32>
    %162 = vector.broadcast %161 : vector<32x1xf32> to vector<32x8xf32>
    %163 = arith.subf %159, %162 : vector<32x8xf32>
    %164 = math.exp %163 : vector<32x8xf32>
    %cst_60 = arith.constant dense<0.000000e+00> : vector<32xf32>
    %165 = vector.multi_reduction <add>, %164, %cst_60 [1] : vector<32x8xf32> to vector<32xf32>
    %166 = vector.shape_cast %165 : vector<32xf32> to vector<32x1xf32>
    %167 = vector.broadcast %166 : vector<32x1xf32> to vector<32x8xf32>
    %168 = arith.divf %164, %167 : vector<32x8xf32>
    %169 = vector.extract_strided_slice %168 {offsets = [0, 0], sizes = [8, 8], strides = [1, 1]} : vector<32x8xf32> to vector<8x8xf32>
    %170 = vector.extract_strided_slice %144 {offsets = [0, 0], sizes = [8, 8], strides = [1, 1]} : vector<8x16xf32> to vector<8x8xf32>
    %cst_61 = arith.constant dense<0.000000e+00> : vector<8x8xf32>
    %171 = tpu.matmul %169, %170, %cst_61 {dimension_numbers = #tpu.dot_dimension_numbers<[1], [0], [0], [1], [0, 0, 1, 1], [], []>} : vector<8x8xf32>, vector<8x8xf32>, vector<8x8xf32> -> vector<8x8xf32>
    %172 = vector.extract_strided_slice %168 {offsets = [8, 0], sizes = [8, 8], strides = [1, 1]} : vector<32x8xf32> to vector<8x8xf32>
    %173 = vector.extract_strided_slice %144 {offsets = [0, 0], sizes = [8, 8], strides = [1, 1]} : vector<8x16xf32> to vector<8x8xf32>
    %cst_62 = arith.constant dense<0.000000e+00> : vector<8x8xf32>
    %174 = tpu.matmul %172, %173, %cst_62 {dimension_numbers = #tpu.dot_dimension_numbers<[1], [0], [0], [1], [0, 0, 1, 1], [], []>} : vector<8x8xf32>, vector<8x8xf32>, vector<8x8xf32> -> vector<8x8xf32>
    %175 = vector.extract_strided_slice %168 {offsets = [16, 0], sizes = [8, 8], strides = [1, 1]} : vector<32x8xf32> to vector<8x8xf32>
    %176 = vector.extract_strided_slice %144 {offsets = [0, 8], sizes = [8, 8], strides = [1, 1]} : vector<8x16xf32> to vector<8x8xf32>
    %cst_63 = arith.constant dense<0.000000e+00> : vector<8x8xf32>
    %177 = tpu.matmul %175, %176, %cst_63 {dimension_numbers = #tpu.dot_dimension_numbers<[1], [0], [0], [1], [0, 0, 1, 1], [], []>} : vector<8x8xf32>, vector<8x8xf32>, vector<8x8xf32> -> vector<8x8xf32>
    %178 = vector.extract_strided_slice %168 {offsets = [24, 0], sizes = [8, 8], strides = [1, 1]} : vector<32x8xf32> to vector<8x8xf32>
    %179 = vector.extract_strided_slice %144 {offsets = [0, 8], sizes = [8, 8], strides = [1, 1]} : vector<8x16xf32> to vector<8x8xf32>
    %cst_64 = arith.constant dense<0.000000e+00> : vector<8x8xf32>
    %180 = tpu.matmul %178, %179, %cst_64 {dimension_numbers = #tpu.dot_dimension_numbers<[1], [0], [0], [1], [0, 0, 1, 1], [], []>} : vector<8x8xf32>, vector<8x8xf32>, vector<8x8xf32> -> vector<8x8xf32>
    %181 = tpu.concatenate %171, %174, %177, %180 in 1 : vector<8x8xf32>, vector<8x8xf32>, vector<8x8xf32>, vector<8x8xf32> -> vector<8x32xf32>
    %c1_65 = arith.constant 1 : index
    %c0_66 = arith.constant 0 : index
    %c0_67 = arith.constant 0 : index
    %182 = vector.load %arg6[%c1_65, %c0_66, %c0_67] : memref<2x32x32xf32, #tpu.memory_space<vmem>>, vector<1x32x32xf32>
    %183 = vector.shape_cast %182 : vector<1x32x32xf32> to vector<32x32xf32>
    %cst_68 = arith.constant dense<0.000000e+00> : vector<8x32xf32>
    %184 = tpu.matmul %181, %183, %cst_68 {dimension_numbers = #tpu.dot_dimension_numbers<[1], [0], [0], [1], [0, 0, 1, 1], [], []>} : vector<8x32xf32>, vector<32x32xf32>, vector<8x32xf32> -> vector<8x32xf32>
    %c1_69 = arith.constant 1 : index
    %c0_70 = arith.constant 0 : index
    %c0_71 = arith.constant 0 : index
    %185 = vector.load %arg4[%c1_69, %c0_70, %c0_71] : memref<2x1x32xf32, #tpu.memory_space<vmem>>, vector<1x1x32xf32>
    %186 = vector.shape_cast %185 : vector<1x1x32xf32> to vector<1x32xf32>
    %187 = arith.mulf %184, %184 : vector<8x32xf32>
    %cst_72 = arith.constant dense<0.000000e+00> : vector<8xf32>
    %188 = vector.multi_reduction <add>, %187, %cst_72 [1] : vector<8x32xf32> to vector<8xf32>
    %189 = vector.shape_cast %188 : vector<8xf32> to vector<8x1xf32>
    %cst_73 = arith.constant 3.200000e+01 : f32
    %190 = vector.broadcast %cst_73 : f32 to vector<8x1xf32>
    %191 = arith.divf %189, %190 : vector<8x1xf32>
    %cst_74 = arith.constant 9.99999997E-7 : f32
    %192 = vector.broadcast %cst_74 : f32 to vector<8x1xf32>
    %193 = arith.addf %191, %192 : vector<8x1xf32>
    %194 = math.rsqrt %193 : vector<8x1xf32>
    %195 = vector.broadcast %194 : vector<8x1xf32> to vector<8x32xf32>
    %196 = arith.mulf %184, %195 : vector<8x32xf32>
    %197 = vector.broadcast %186 : vector<1x32xf32> to vector<8x32xf32>
    %198 = arith.mulf %196, %197 : vector<8x32xf32>
    %199 = tpu.concatenate %198, %198 in 0 : vector<8x32xf32>, vector<8x32xf32> -> vector<16x32xf32>
    %200 = arith.addf %118, %199 : vector<16x32xf32>
    %c1_75 = arith.constant 1 : index
    %c0_76 = arith.constant 0 : index
    %c0_77 = arith.constant 0 : index
    %201 = vector.load %arg7[%c1_75, %c0_76, %c0_77] : memref<2x32x128xf32, #tpu.memory_space<vmem>>, vector<1x32x128xf32>
    %202 = vector.shape_cast %201 : vector<1x32x128xf32> to vector<32x128xf32>
    %cst_78 = arith.constant dense<0.000000e+00> : vector<16x128xf32>
    %203 = tpu.matmul %200, %202, %cst_78 {dimension_numbers = #tpu.dot_dimension_numbers<[1], [0], [0], [1], [0, 0, 1, 1], [], []>} : vector<16x32xf32>, vector<32x128xf32>, vector<16x128xf32> -> vector<16x128xf32>
    %204 = vector.extract_strided_slice %203 {offsets = [0, 0], sizes = [16, 64], strides = [1, 1]} : vector<16x128xf32> to vector<16x64xf32>
    %205 = vector.extract_strided_slice %203 {offsets = [0, 64], sizes = [16, 64], strides = [1, 1]} : vector<16x128xf32> to vector<16x64xf32>
    %206 = arith.negf %204 : vector<16x64xf32>
    %207 = math.exp %206 : vector<16x64xf32>
    %cst_79 = arith.constant 1.000000e+00 : f32
    %208 = vector.broadcast %cst_79 : f32 to vector<16x64xf32>
    %209 = arith.addf %208, %207 : vector<16x64xf32>
    %210 = arith.divf %208, %209 : vector<16x64xf32>
    %211 = arith.mulf %204, %210 : vector<16x64xf32>
    %212 = arith.mulf %211, %205 : vector<16x64xf32>
    %c1_80 = arith.constant 1 : index
    %c0_81 = arith.constant 0 : index
    %c0_82 = arith.constant 0 : index
    %213 = vector.load %arg8[%c1_80, %c0_81, %c0_82] : memref<2x64x32xf32, #tpu.memory_space<vmem>>, vector<1x64x32xf32>
    %214 = vector.shape_cast %213 : vector<1x64x32xf32> to vector<64x32xf32>
    %cst_83 = arith.constant dense<0.000000e+00> : vector<16x32xf32>
    %215 = tpu.matmul %212, %214, %cst_83 {dimension_numbers = #tpu.dot_dimension_numbers<[1], [0], [0], [1], [0, 0, 1, 1], [], []>} : vector<16x64xf32>, vector<64x32xf32>, vector<16x32xf32> -> vector<16x32xf32>
    %216 = arith.addf %200, %215 : vector<16x32xf32>
    %c0_84 = arith.constant 0 : index
    %c0_85 = arith.constant 0 : index
    %217 = vector.load %arg9[%c0_84, %c0_85] : memref<1x32xf32, #tpu.memory_space<vmem>>, vector<1x32xf32>
    %218 = arith.mulf %216, %216 : vector<16x32xf32>
    %cst_86 = arith.constant dense<0.000000e+00> : vector<16xf32>
    %219 = vector.multi_reduction <add>, %218, %cst_86 [1] : vector<16x32xf32> to vector<16xf32>
    %220 = vector.shape_cast %219 : vector<16xf32> to vector<16x1xf32>
    %cst_87 = arith.constant 3.200000e+01 : f32
    %221 = vector.broadcast %cst_87 : f32 to vector<16x1xf32>
    %222 = arith.divf %220, %221 : vector<16x1xf32>
    %cst_88 = arith.constant 9.99999997E-7 : f32
    %223 = vector.broadcast %cst_88 : f32 to vector<16x1xf32>
    %224 = arith.addf %222, %223 : vector<16x1xf32>
    %225 = math.rsqrt %224 : vector<16x1xf32>
    %226 = vector.broadcast %225 : vector<16x1xf32> to vector<16x32xf32>
    %227 = arith.mulf %216, %226 : vector<16x32xf32>
    %228 = vector.broadcast %217 : vector<1x32xf32> to vector<16x32xf32>
    %229 = arith.mulf %227, %228 : vector<16x32xf32>
    %c0_89 = arith.constant 0 : index
    %c0_90 = arith.constant 0 : index
    %230 = vector.load %arg10[%c0_89, %c0_90] : memref<16x32xf32, #tpu.memory_space<vmem>>, vector<16x32xf32>
    tpu.vector_store %arg10[%c0_89, %c0_90], %229 {strides = array<i32>} : memref<16x32xf32, #tpu.memory_space<vmem>>, vector<16x32xf32>,
    return
  }
  func.func @transform_0(%arg0: i32) -> (i32, i32) {
    %c0_i32 = arith.constant 0 : i32
    %c0_i32_0 = arith.constant 0 : i32
    %c0_i32_1 = arith.constant 0 : i32
    return %c0_i32, %c0_i32_0 : i32, i32
  }
  func.func @transform_1(%arg0: i32) -> (i32, i32) {
    %c0_i32 = arith.constant 0 : i32
    %c0_i32_0 = arith.constant 0 : i32
    %c0_i32_1 = arith.constant 0 : i32
    return %c0_i32, %c0_i32_0 : i32, i32
  }
  func.func @transform_2(%arg0: i32) -> (i32, i32, i32) {
    %c0_i32 = arith.constant 0 : i32
    %c0_i32_0 = arith.constant 0 : i32
    %c0_i32_1 = arith.constant 0 : i32
    %c0_i32_2 = arith.constant 0 : i32
    return %c0_i32, %c0_i32_0, %c0_i32_1 : i32, i32, i32
  }
  func.func @transform_3(%arg0: i32) -> (i32, i32, i32) {
    %c0_i32 = arith.constant 0 : i32
    %c0_i32_0 = arith.constant 0 : i32
    %c0_i32_1 = arith.constant 0 : i32
    %c0_i32_2 = arith.constant 0 : i32
    return %c0_i32, %c0_i32_0, %c0_i32_1 : i32, i32, i32
  }
  func.func @transform_4(%arg0: i32) -> (i32, i32, i32) {
    %c0_i32 = arith.constant 0 : i32
    %c0_i32_0 = arith.constant 0 : i32
    %c0_i32_1 = arith.constant 0 : i32
    %c0_i32_2 = arith.constant 0 : i32
    return %c0_i32, %c0_i32_0, %c0_i32_1 : i32, i32, i32
  }
  func.func @transform_5(%arg0: i32) -> (i32, i32, i32) {
    %c0_i32 = arith.constant 0 : i32
    %c0_i32_0 = arith.constant 0 : i32
    %c0_i32_1 = arith.constant 0 : i32
    %c0_i32_2 = arith.constant 0 : i32
    return %c0_i32, %c0_i32_0, %c0_i32_1 : i32, i32, i32
  }
  func.func @transform_6(%arg0: i32) -> (i32, i32, i32) {
    %c0_i32 = arith.constant 0 : i32
    %c0_i32_0 = arith.constant 0 : i32
    %c0_i32_1 = arith.constant 0 : i32
    %c0_i32_2 = arith.constant 0 : i32
    return %c0_i32, %c0_i32_0, %c0_i32_1 : i32, i32, i32
  }
  func.func @transform_7(%arg0: i32) -> (i32, i32, i32) {
    %c0_i32 = arith.constant 0 : i32
    %c0_i32_0 = arith.constant 0 : i32
    %c0_i32_1 = arith.constant 0 : i32
    %c0_i32_2 = arith.constant 0 : i32
    return %c0_i32, %c0_i32_0, %c0_i32_1 : i32, i32, i32
  }
  func.func @transform_8(%arg0: i32) -> (i32, i32) {
    %c0_i32 = arith.constant 0 : i32
    %c0_i32_0 = arith.constant 0 : i32
    %c0_i32_1 = arith.constant 0 : i32
    return %c0_i32, %c0_i32_0 : i32, i32
  }
  func.func @transform_9(%arg0: i32) -> (i32, i32) {
    %c0_i32 = arith.constant 0 : i32
    %c0_i32_0 = arith.constant 0 : i32
    %c0_i32_1 = arith.constant 0 : i32
    return %c0_i32, %c0_i32_0 : i32, i32
  }
}

</mosaic_0001>

<bundles_post_ra>
// kernel: tile.39
= control target key start
LH: loop header
LB: loop body
LE: loop exit
PB: predicated region body
PF: predicated region fallthrough
CT: control target
= control target key end

     0   :  { %vm42_vm0 = vcmask 1047556   ;;  %vm44_vm1 = vcmask 64512   ;;  %vm54_vm2 = vcmask 130112   ;;  %s111_s0 = inlined_call_operand.vmem [shape: f32[8,2,8], index: 0, kind: input, shape index: {}]   ;;  %s112_s1 = inlined_call_operand.vmem [shape: f32[8,16], index: 1, kind: output, shape index: {}]  }
   0x1   :  { %v62_v0 = vld [vmem:[%s111_s0 + $0xe] sm:$0x3]  ;;  %v63_v1 = vld [vmem:[%s111_s0 + $0xc] sm:$0x3]  ;;  %v64_v2 = vld [vmem:[%s111_s0 + $0xa] sm:$0x3] }
   0x2   :  { %8 = vst [vmem:[#allocation0 + $0x38] sm:$0x3] %v62_v0  ;;  %13 = vst [vmem:[#allocation0 + $0x30] sm:$0x3] %v63_v1  ;;  %v65_v3 = vld [vmem:[%s111_s0 + $0x8] sm:$0x3] }
   0x3   :  { %18 = vst [vmem:[#allocation0 + $0x28] sm:$0x3] %v64_v2  ;;  %v66_v4 = vld [vmem:[%s111_s0 + $0x6] sm:$0x3]  ;;  %v67_v5 = vld [vmem:[%s111_s0 + $0x4] sm:$0x3] }
   0x4   :  { %23 = vst [vmem:[#allocation0 + $0x20] sm:$0x3] %v65_v3  ;;  %28 = vst [vmem:[#allocation0 + $0x18] sm:$0x3] %v66_v4  ;;  %v68_v6 = vld [vmem:[%s111_s0 + $0x2] sm:$0x3] }
   0x5   :  { %33 = vst [vmem:[#allocation0 + $0x10] sm:$0x3] %v67_v5  ;;  %v38_v7 = vld [vmem:[%s111_s0] sm:$0x3]  ;;  %37 = vst [vmem:[#allocation0 + $0x8] sm:$0x3] %v68_v6 }
   0x6   :  { %39 = vst [vmem:[#allocation0] sm:$0x3] %v38_v7  ;;  %s70_s0 = smov 8  }
   0xb   :  { %v41_v8 = vld [vmem:[#allocation0] ss:$8 sm:$0xf0]   ;;  %v49_v9 = vld [vmem:[#allocation0 + $0x1] ss:$8 sm:$0xf0]  }
   0xd   :  { %v40_v10 = vld [vmem:[#allocation0] ss:$8 sm:$0xf]   ;;  %v47_v11 = vld [vmem:[#allocation0 + $0x1] ss:$8 sm:$0xf]  }
   0xe   :  { %v43_v12 = vsel %vm42_vm0, %v41_v8, %v40_v10  ;;  %v51_v13 = vsel %vm42_vm0, %v49_v9, %v47_v11 }
   0xf   :  { %52 = vrot.lane.b32.xlu0 %v51_v13, %s70_s0  ;;  %45 = vst.msk [vmem:[%s112_s1] sm:$0xff] %vm44_vm1, %v43_v12  }
  0x81   :  { %v53_v14 = vpop.permute.xlu0 %52  }
  0x82   :  { %55 = vst.msk [vmem:[%s112_s1] sm:$0xff] %vm54_vm2, %v53_v14  }

// kernel: mistral_forward.1
= control target key start
LH: loop header
LB: loop body
LE: loop exit
PB: predicated region body
PF: predicated region fallthrough
CT: control target
= control target key end

     0   :  { %vm97_vm0 = vcmask 261120   ;;  %s3229_s0 = inlined_call_operand.vmem [shape: f32[16,32], index: 0, kind: input, shape index: {}]   ;;  %s3230_s1 = inlined_call_operand.vmem [shape: f32[8,128], index: 1, kind: input, shape index: {}]   ;;  %s3231_s2 = inlined_call_operand.vmem [shape: f32[2,1,32], index: 2, kind: input, shape index: {}]   ;;  %s3232_s3 = inlined_call_operand.vmem [shape: f32[2,1,32], index: 3, kind: input, shape index: {}]   ;;  %s3233_s4 = inlined_call_operand.vmem [shape: f32[2,32,128], index: 4, kind: input, shape index: {}]   ;;  %s3234_s5 = inlined_call_operand.vmem [shape: f32[2,32,32], index: 5, kind: input, shape index: {}]   ;;  %s3235_s6 = inlined_call_operand.vmem [shape: f32[2,32,128], index: 6, kind: input, shape index: {}]   ;;  %s3236_s7 = inlined_call_operand.vmem [shape: f32[2,64,32], index: 7, kind: input, shape index: {}]   ;;  %s3237_s8 = inlined_call_operand.vmem [shape: f32[1,32], index: 8, kind: input, shape index: {}]   ;;  %s3238_s9 = inlined_call_operand.hbm [shape: f32[16,32], index: 9, kind: output, shape index: {}]  }
   0x1   :  { %v2852_v0 = vld [vmem:[%s3229_s0] sm:$0xff] }
   0x2   :  { %14 = vsyncpa [#allocation3], 0  ;;  %v96_v1 = vmul.f32 %v2852_v0, %v2852_v0  ;;  %v113_v3 = vld [vmem:[%s3233_s4] sm:$0xff]  ;;  %v114_v4 = vld [vmem:[%s3233_s4 + $0x8] sm:$0xff]  ;;  %v2784_v6 = vmov 0.0|0.0   ;;  %vm2785_vm1 = vmmov 0   ;;  %v34_v31 = vlaneseq }
   0x3   :  { %v115_v5 = vld [vmem:[%s3233_s4 + $0x10] sm:$0xff]  ;;  %2613 = vmatprep.subr.bf16.mxu1 %v2784_v6  ;;  %v2614_v7 = vpack.c.bf16 %v114_v4, %v113_v3  ;;  %v116_v8 = vld [vmem:[%s3233_s4 + $0x18] sm:$0xff]  ;;  %v2786_v9 = vmov 0.0   ;;  %v2278_v15 = vld [vmem:[%s3231_s2] ss:$0 sm:$0xff]  ;;  %s2787_s23 = smov 96  }
   0x4   :  { %v98_v2 = vsel %vm97_vm0, %v96_v1, 0.0  ;;  %2437 = vmatprep.mubr.msk.f32.mxu1 %vm2785_vm1, %v2786_v9  ;;  %2450 = vmatprep.subr.mxu0 %v2786_v9  ;;  %v2617_v10 = vpack.c.bf16 %v116_v8, %v115_v5  ;;  %v2887_v18 = vld [vmem:[%s3230_s1] sm:$0xff]  ;;  %s2788_s24 = smov 112   ;;  %s2789_s25 = smov 64   ;;  %vm203_vm2 = vcmask 64512   ;;  %v35_v32 = vshrl.u32 %v34_v31, 7 }
   0x5   :  { %99 = vadd.xlane.f32.xlu0 %v98_v2  ;;  %2452 = vmatprep.mubr.msk.f32.mxu0 %vm2785_vm1, %v2786_v9  ;;  %s2790_s1 = smov 120   ;;  %s2791_s26 = smov 56   ;;  %v40_v33 = vand.u32 127, %v34_v31  ;;  %vm865_vm7 = vcmask 130048   ;;  %vm867_vm8 = vcmask 195584   ;;  %vm1081_vm9 = vcmask 523264  }
   0x6   :  { %2615 = vmatpush3.bf16.msra.mxu1 %v2614_v7  ;;  %s2792_s27 = smov 104   ;;  %v45_v34 = vand.u32 7, %v35_v32  ;;  %v36_v35 = vadd.s32 8, %v35_v32  ;;  %v37_v38 = vadd.s32 16, %v35_v32  ;;  %v38_v45 = vadd.s32 24, %v35_v32  ;;  %s2793_s28 = smov 24  }
   0x7   :  { %2616 = vmatprep.subr.bf16.mxu1 %v2784_v6  ;;  %s2794_s29 = smov 32   ;;  %s2795_s17 = smov 8  }
   0x8   :  { %vm2920_vm3 = vcmp.le.s32.totalorder %v40_v33, %v45_v34  ;;  %v52_v37 = vand.u32 7, %v36_v35  ;;  %v59_v44 = vand.u32 7, %v37_v38  ;;  %v66_v51 = vand.u32 7, %v38_v45  ;;  %v869_v35 = vld [vmem:[%s3234_s5] sm:$0xff]  ;;  %s2796_s18 = smov 16  }
   0xa   :  { %2618 = vmatpush3.bf16.msra.mxu1 %v2617_v10  ;;  %vm2927_vm4 = vcmp.le.s32.totalorder %v40_v33, %v52_v37  ;;  %vm2934_vm5 = vcmp.le.s32.totalorder %v40_v33, %v59_v44  ;;  %vm2941_vm6 = vcmp.le.s32.totalorder %v40_v33, %v66_v51  ;;  %v870_v37 = vld [vmem:[%s3234_s5 + $0x8] sm:$0xff] }
   0xb   :  { %2440 = vmatprep.subr.mxu1 %v2786_v9  ;;  %v2620_v38 = vpack.c.bf16 %v870_v37, %v869_v35 }
  0x92   :  { %v100_v11 = vpop.xlane.xlu0 %99 }
  0x93   :  { %v102_v12 = vmul.f32 0.03125, %v100_v11 }
  0x95   :  { %v103_v13 = vadd.f32 1e-06, %v102_v12 }
  0x97   :  { %2700 = vrsqrt.f32 %v103_v13 }
  0xa1   :  { %v2701_v14 = vpop.eup %2700 }
  0xa2   :  { %v105_v16 = vmul.f32 %v2701_v14, %v2852_v0 }
  0xa4   :  { %v112_v17 = vmul.f32 %v2278_v15, %v105_v16 }
  0xa6   :  { %2438 = vmatmul.mubr.msk.f32.vlgmr.msra.gmra.mrb[0].mxu1 %vm97_vm0, %v112_v17 }
  0xa7   :  { %2442 = vmatprep.mubr.msk.f32.mxu1 %vm2785_vm1, %v2786_v9 }
 0x179   :  { %v2889_v19 = vpop.f32.mrb[0].mxu1 }
 0x17a   :  { %v190_v20 = vmul.f32 %v2889_v19, %v2887_v18  ;;  %v2439_v21 = vpop.f32.mrb[1].mxu1 }
 0x17c   :  { %192 = vrot.lane.b32.xlu1 %v190_v20, %s2787_s23  ;;  %196 = vrot.lane.b32.xlu0 %v190_v20, %s2788_s24 }
 0x1ee   :  { %v197_v22 = vpop.permute.xlu0 %196  ;;  %v193_v24 = vpop.permute.xlu1 %192 }
 0x1ef   :  { %v199_v23 = vadd.f32 %v197_v22, %v190_v20  ;;  %v195_v25 = vadd.f32 %v193_v24, %v190_v20 }
 0x1f1   :  { %201 = vrot.lane.b32.xlu1 %v199_v23, %s2789_s25 }
 0x1f5   :  { %279 = vrot.lane.b32.xlu1 %v195_v25, %s2790_s1 }
 0x1f9   :  { %355 = vrot.lane.b32.xlu1 %v199_v23, %s2791_s26 }
 0x1fd   :  { %353 = vrot.lane.b32.xlu1 %v195_v25, %s2788_s24 }
 0x201   :  { %431 = vrot.lane.b32.xlu1 %v195_v25, %s2792_s27 }
 0x263   :  { %v202_v26 = vpop.permute.xlu1 %201 }
 0x264   :  { %2441 = vmatpush3.xpose.msk.msra.mxu1 %vm203_vm2, %v202_v26 }
 0x265   :  { %2445 = vmatprep.subr.mxu1 %v2786_v9 }
 0x267   :  { %2443 = vmatmul.mubr.msk.f32.vlgmr.msra.gmra.mrb[2].mxu1 %vm203_vm2, %v195_v25  ;;  %v280_v27 = vpop.permute.xlu1 %279 }
 0x268   :  { %2446 = vmatpush3.xpose.msk.msra.mxu1 %vm203_vm2, %v202_v26  ;;  %2447 = vmatprep.mubr.msk.f32.mxu1 %vm2785_vm1, %v2786_v9 }
 0x269   :  { %2455 = vmatprep.subr.mxu1 %v2786_v9 }
 0x26b   :  { %2448 = vmatmul.mubr.msk.f32.vlgmr.msra.gmra.mrb[4].mxu1 %vm203_vm2, %v280_v27  ;;  %v356_v28 = vpop.permute.xlu1 %355 }
 0x26c   :  { %2451 = vmatpush3.xpose.msk.msra.mxu0 %vm203_vm2, %v356_v28  ;;  %2456 = vmatpush3.xpose.msk.msra.mxu1 %vm203_vm2, %v356_v28 }
 0x26d   :  { %2457 = vmatprep.mubr.msk.f32.mxu1 %vm2785_vm1, %v2786_v9  ;;  %2460 = vmatprep.subr.mxu0 %v2786_v9 }
 0x26e   :  { %2465 = vmatprep.subr.mxu1 %v2786_v9 }
 0x26f   :  { %v354_v29 = vpop.permute.xlu1 %353 }
 0x270   :  { %2453 = vmatmul.mubr.msk.f32.vlgmr.msra.gmra.mrb[0].mxu0 %vm203_vm2, %v354_v29 }
 0x271   :  { %2462 = vmatprep.mubr.msk.f32.mxu0 %vm2785_vm1, %v2786_v9 }
 0x273   :  { %v432_v30 = vpop.permute.xlu1 %431 }
 0x274   :  { %2458 = vmatmul.mubr.msk.f32.vlgmr.msra.gmra.mrb[6].mxu1 %vm203_vm2, %v432_v30 }
 0x275   :  { %2467 = vmatprep.mubr.msk.f32.mxu1 %vm2785_vm1, %v2786_v9 }
 0x33a   :  { %v275_v39 = vpop.f32.mrb[2].mxu1 }
 0x33b   :  { %v505_v40 = vsel %vm2920_vm3, %v275_v39, -1e+30  ;;  %v2444_v41 = vpop.f32.mrb[3].mxu1  ;;  %v871_v39 = vld [vmem:[%s3234_s5 + $0x10] sm:$0xff] }
 0x33c   :  { %v509_v42 = vsel %vm203_vm2, %v505_v40, -inf }
 0x33d   :  { %510 = vmax.xlane.f32.xlu1 %v509_v42 }
 0x33e   :  { %v349_v46 = vpop.f32.mrb[4].mxu1 }
 0x33f   :  { %v506_v47 = vsel %vm2927_vm4, %v349_v46, -1e+30  ;;  %v2449_v48 = vpop.f32.mrb[5].mxu1 }
 0x340   :  { %v512_v49 = vsel %vm203_vm2, %v506_v47, -inf }
 0x341   :  { %513 = vmax.xlane.f32.xlu0 %v512_v49 }
 0x343   :  { %v427_v52 = vpop.f32.mrb[0].mxu0 }
 0x344   :  { %v507_v53 = vsel %vm2934_vm5, %v427_v52, -1e+30  ;;  %v2454_v54 = vpop.f32.mrb[1].mxu0 }
 0x345   :  { %v515_v55 = vsel %vm203_vm2, %v507_v53, -inf }
 0x346   :  { %516 = vmax.xlane.f32.xlu0 %v515_v55 }
 0x347   :  { %v501_v57 = vpop.f32.mrb[6].mxu1 }
 0x348   :  { %v508_v58 = vsel %vm2941_vm6, %v501_v57, -1e+30  ;;  %v2459_v59 = vpop.f32.mrb[7].mxu1 }
 0x349   :  { %v518_v60 = vsel %vm203_vm2, %v508_v58, -inf }
 0x34a   :  { %519 = vmax.xlane.f32.xlu1 %v518_v60 }
 0x3ca   :  { %v511_v61 = vpop.xlane.xlu1 %510 }
 0x3cb   :  { %v521_v62 = vsub.f32 %v505_v40, %v511_v61  ;;  %v872_v40 = vld [vmem:[%s3234_s5 + $0x18] sm:$0xff] }
 0x3cc   :  { %v2623_v41 = vpack.c.bf16 %v872_v40, %v871_v39 }
 0x3cd   :  { %v525_v63 = vmul.f32 1.442695, %v521_v62 }
 0x3ce   :  { %v514_v1 = vpop.xlane.xlu0 %513 }
 0x3cf   :  { %2702 = vpow2.f32 %v525_v63  ;;  %v522_v2 = vsub.f32 %v506_v47, %v514_v1  ;;  %v964_v63 = vld [vmem:[%s3235_s6] sm:$0xff]  ;;  %v965_v1 = vld [vmem:[%s3235_s6 + $0x8] sm:$0xff] }
 0x3d1   :  { %v527_v3 = vmul.f32 1.442695, %v522_v2  ;;  %v966_v2 = vld [vmem:[%s3235_s6 + $0x10] sm:$0xff] }
 0x3d3   :  { %2704 = vpow2.f32 %v527_v3  ;;  %v517_v4 = vpop.xlane.xlu0 %516  ;;  %v2625_v3 = vpack.c.bf16 %v965_v1, %v964_v63 }
 0x3d4   :  { %v523_v5 = vsub.f32 %v507_v53, %v517_v4  ;;  %v967_v4 = vld [vmem:[%s3235_s6 + $0x18] sm:$0xff] }
 0x3d6   :  { %v529_v7 = vmul.f32 1.442695, %v523_v5  ;;  %v2629_v5 = vpack.c.bf16 %v967_v4, %v966_v2  ;;  %v2301_v2 = vld [vmem:[%s3231_s2 + $0x1] ss:$0 sm:$0xff] }
 0x3d7   :  { %v520_v8 = vpop.xlane.xlu1 %519 }
 0x3d8   :  { %2706 = vpow2.f32 %v529_v7  ;;  %v524_v10 = vsub.f32 %v508_v58, %v520_v8 }
 0x3d9   :  { %v2703_v11 = vpop.eup %2702 }
 0x3da   :  { %v531_v12 = vmul.f32 1.442695, %v524_v10  ;;  %v533_v13 = vsel %vm203_vm2, %v2703_v11, 0.0 }
 0x3db   :  { %534 = vadd.xlane.f32.xlu0 %v533_v13 }
 0x3dc   :  { %2708 = vpow2.f32 %v531_v12  ;;  %v2293_v12 = vld [vmem:[%s3232_s3] ss:$0 sm:$0xff] }
 0x3dd   :  { %v2705_v14 = vpop.eup %2704 }
 0x3de   :  { %v536_v15 = vsel %vm203_vm2, %v2705_v14, 0.0 }
 0x3df   :  { %537 = vadd.xlane.f32.xlu1 %v536_v15 }
 0x3e2   :  { %v2707_v16 = vpop.eup %2706 }
 0x3e3   :  { %v539_v17 = vsel %vm203_vm2, %v2707_v16, 0.0 }
 0x3e4   :  { %540 = vadd.xlane.f32.xlu0 %v539_v17 }
 0x3e6   :  { %v2709_v20 = vpop.eup %2708 }
 0x3e7   :  { %v542_v21 = vsel %vm203_vm2, %v2709_v20, 0.0 }
 0x3e8   :  { %543 = vadd.xlane.f32.xlu1 %v542_v21  ;;  %v1074_v21 = vld [vmem:[%s3236_s7 + $0x8] sm:$0xff] }
 0x3f9   :  { %703 = vrot.lane.b32.xlu1 %v2889_v19, %s2793_s28 }
 0x3fa   :  { %554 = vrot.lane.b32.xlu0 %v2889_v19, %s2794_s29 }
 0x468   :  { %v535_v22 = vpop.xlane.xlu0 %534 }
 0x469   :  { %2710 = vrcp.f32 %v535_v22 }
 0x46c   :  { %v538_v23 = vpop.xlane.xlu1 %537 }
 0x46d   :  { %2712 = vrcp.f32 %v538_v23  ;;  %v1076_v23 = vld [vmem:[%s3236_s7 + $0x18] sm:$0xff] }
 0x471   :  { %v541_v24 = vpop.xlane.xlu0 %540 }
 0x472   :  { %2714 = vrcp.f32 %v541_v24 }
 0x473   :  { %v2711_v25 = vpop.eup %2710 }
 0x474   :  { %v546_v26 = vmul.f32 %v2711_v25, %v2703_v11  ;;  %v1077_v25 = vld [vmem:[%s3236_s7 + $0x20] sm:$0xff] }
 0x475   :  { %v555_v27 = vpop.permute.xlu0 %554  ;;  %v544_v28 = vpop.xlane.xlu1 %543 }
 0x476   :  { %2716 = vrcp.f32 %v544_v28  ;;  %2461 = vmatpush3.msra.mxu0 %v555_v27  ;;  %2466 = vmatpush3.msra.mxu1 %v555_v27  ;;  %v1079_v28 = vld [vmem:[%s3236_s7 + $0x30] sm:$0xff] }
 0x477   :  { %v2713_v29 = vpop.eup %2712  ;;  %2463 = vmatmul.mubr.msk.f32.vlgmr.msra.gmra.mrb[2].mxu0 %vm203_vm2, %v546_v26  ;;  %2470 = vmatprep.subr.mxu0 %v2786_v9  ;;  %v1078_v26 = vld [vmem:[%s3236_s7 + $0x28] sm:$0xff] }
 0x478   :  { %v548_v30 = vmul.f32 %v2713_v29, %v2705_v14  ;;  %2475 = vmatprep.subr.mxu1 %v2786_v9  ;;  %2472 = vmatprep.mubr.msk.f32.mxu0 %vm2785_vm1, %v2786_v9  ;;  %v94_v14 = vld [vmem:[%s3229_s0 + $0x8] sm:$0xff]  ;;  %v2641_v27 = vpack.c.bf16 %v1078_v26, %v1077_v25  ;;  %v1080_v29 = vld [vmem:[%s3236_s7 + $0x38] sm:$0xff] }
 0x479   :  { %v704_v19 = vpop.permute.xlu1 %703 }
 0x47a   :  { %2468 = vmatmul.mubr.msk.f32.vlgmr.msra.gmra.mrb[8].mxu1 %vm203_vm2, %v548_v30  ;;  %2471 = vmatpush3.msra.mxu0 %v704_v19  ;;  %v2645_v30 = vpack.c.bf16 %v1080_v29, %v1079_v28 }
 0x47b   :  { %2476 = vmatpush3.msra.mxu1 %v704_v19  ;;  %2477 = vmatprep.mubr.msk.f32.mxu1 %vm2785_vm1, %v2786_v9 }
 0x47c   :  { %v2715_v31 = vpop.eup %2714  ;;  %2619 = vmatprep.subr.bf16.mxu0 %v2784_v6  ;;  %2626 = vmatprep.subr.bf16.mxu1 %v2625_v3 }
 0x47d   :  { %v550_v32 = vmul.f32 %v2715_v31, %v2707_v16 }
 0x47f   :  { %2473 = vmatmul.mubr.msk.f32.vlgmr.msra.gmra.mrb[4].mxu0 %vm203_vm2, %v550_v32 }
 0x480   :  { %v2717_v33 = vpop.eup %2716  ;;  %2488 = vmatprep.mubr.msk.f32.mxu0 %vm2785_vm1, %v2786_v9  ;;  %2621 = vmatpush3.bf16.msra.mxu0 %v2620_v38 }
 0x481   :  { %v552_v34 = vmul.f32 %v2717_v33, %v2709_v20  ;;  %2622 = vmatprep.subr.bf16.mxu0 %v2784_v6  ;;  %v1073_v20 = vld [vmem:[%s3236_s7] sm:$0xff] }
 0x482   :  { %v2633_v22 = vpack.c.bf16 %v1074_v21, %v1073_v20 }
 0x483   :  { %2478 = vmatmul.mubr.msk.f32.vlgmr.msra.gmra.mrb[10].mxu1 %vm203_vm2, %v552_v34 }
 0x484   :  { %2624 = vmatpush3.bf16.msra.mxu0 %v2623_v41  ;;  %2628 = vmatpush3.bf16.msra.mxu1 %v2625_v3 }
 0x485   :  { %2630 = vmatprep.subr.bf16.mxu1 %v2629_v5  ;;  %2634 = vmatprep.subr.bf16.mxu0 %v2633_v22 }
 0x488   :  { %2632 = vmatpush3.bf16.msra.mxu1 %v2629_v5 }
 0x489   :  { %2649 = vmatprep.subr.bf16.mxu1 %v2784_v6 }
 0x54a   :  { %v626_v42 = vpop.f32.mrb[2].mxu0 }
 0x54b   :  { %v2464_v44 = vpop.f32.mrb[3].mxu0 }
 0x54d   :  { %v699_v45 = vpop.f32.mrb[8].mxu1 }
 0x54e   :  { %853 = vrot.lane.b32.xlu1 %v699_v45, %s2795_s17  ;;  %v2469_v46 = vpop.f32.mrb[9].mxu1 }
 0x552   :  { %v775_v47 = vpop.f32.mrb[4].mxu0 }
 0x553   :  { %857 = vrot.lane.b32.xlu0 %v775_v47, %s2796_s18  ;;  %v2474_v48 = vpop.f32.mrb[5].mxu0 }
 0x556   :  { %v848_v49 = vpop.f32.mrb[10].mxu1 }
 0x557   :  { %861 = vrot.lane.b32.xlu1 %v848_v49, %s2793_s28  ;;  %v2479_v51 = vpop.f32.mrb[11].mxu1 }
 0x5c0   :  { %v854_v52 = vpop.permute.xlu1 %853 }
 0x5c1   :  { %v864_v54 = vsel %vm203_vm2, %v626_v42, %v854_v52 }
 0x5c5   :  { %v858_v53 = vpop.permute.xlu0 %857 }
 0x5c6   :  { %v866_v55 = vsel %vm865_vm7, %v864_v54, %v858_v53  ;;  %v2302_v54 = vld [vmem:[%s3233_s4 + $0x20] sm:$0xff] }
 0x5c9   :  { %v862_v57 = vpop.permute.xlu1 %861 }
 0x5ca   :  { %v868_v58 = vsel %vm867_vm8, %v866_v55, %v862_v57  ;;  %v2303_v55 = vld [vmem:[%s3233_s4 + $0x28] sm:$0xff] }
 0x5cb   :  { %2489 = vmatmul.mubr.msk.f32.vlgmr.msra.gmra.mrb[6].mxu0 %vm97_vm0, %v868_v58  ;;  %v2650_v57 = vpack.c.bf16 %v2303_v55, %v2302_v54  ;;  %v2304_v58 = vld [vmem:[%s3233_s4 + $0x30] sm:$0xff] }
 0x5cc   :  { %2636 = vmatpush3.bf16.msra.mxu0 %v2633_v22 }
 0x69e   :  { %v942_v59 = vpop.f32.mrb[6].mxu0 }
 0x69f   :  { %v947_v60 = vmul.f32 %v942_v59, %v942_v59  ;;  %v2490_v61 = vpop.f32.mrb[7].mxu0 }
 0x6a1   :  { %v948_v62 = vsel %vm97_vm0, %v947_v60, 0.0 }
 0x6a2   :  { %949 = vadd.xlane.f32.xlu0 %v948_v62 }
 0x72f   :  { %v950_v7 = vpop.xlane.xlu0 %949 }
 0x730   :  { %v951_v8 = vmul.f32 0.03125, %v950_v7 }
 0x732   :  { %v952_v10 = vadd.f32 1e-06, %v951_v8 }
 0x734   :  { %2718 = vrsqrt.f32 %v952_v10 }
 0x73e   :  { %v2719_v11 = vpop.eup %2718 }
 0x73f   :  { %v954_v13 = vmul.f32 %v2719_v11, %v942_v59  ;;  %v2305_v59 = vld [vmem:[%s3233_s4 + $0x38] sm:$0xff] }
 0x740   :  { %v2653_v60 = vpack.c.bf16 %v2305_v59, %v2304_v58 }
 0x741   :  { %v961_v15 = vmul.f32 %v2293_v12, %v954_v13 }
 0x743   :  { %v962_v16 = vadd.f32 %v961_v15, %v2852_v0  ;;  %v3010_v17 = vadd.f32 %v961_v15, %v94_v14  ;;  %v1075_v0 = vld [vmem:[%s3236_s7 + $0x10] sm:$0xff] }
 0x744   :  { %v2637_v24 = vpack.c.bf16 %v1076_v23, %v1075_v0 }
 0x745   :  { %2499 = vmatprep.mubr.msk.f32.mxu1 %vm97_vm0, %v962_v16 }
 0x746   :  { %2500 = vmatmul.mubr.msk.f32.vlgmr.msra.gmra.mrb[12].mxu1 %vm97_vm0, %v3010_v17  ;;  %2638 = vmatprep.subr.bf16.mxu0 %v2637_v24 }
 0x747   :  { %2529 = vmatprep.mubr.msk.f32.mxu1 %vm2785_vm1, %v2786_v9  ;;  %2640 = vmatpush3.bf16.msra.mxu0 %v2637_v24 }
 0x748   :  { %2642 = vmatprep.subr.bf16.mxu0 %v2641_v27  ;;  %2651 = vmatpush3.bf16.msra.mxu1 %v2650_v57 }
 0x749   :  { %2652 = vmatprep.subr.bf16.mxu1 %v2784_v6 }
 0x74b   :  { %2644 = vmatpush3.bf16.msra.mxu0 %v2641_v27 }
 0x74c   :  { %2646 = vmatprep.subr.bf16.mxu0 %v2645_v30  ;;  %2654 = vmatpush3.bf16.msra.mxu1 %v2653_v60 }
 0x74d   :  { %2532 = vmatprep.subr.mxu1 %v2786_v9 }
 0x74f   :  { %2648 = vmatpush3.bf16.msra.mxu0 %v2645_v30 }
 0x750   :  { %2542 = vmatprep.subr.mxu0 %v2786_v9 }
 0x819   :  { %v2501_v19 = vpop.f32.mrb[12].mxu1 }
 0x81a   :  { %v1040_v31 = vpop.f32.mrb[13].mxu1  ;;  %v2297_v33 = vmul.f32 -1.442695, %v2501_v19 }
 0x81b   :  { %1065 = vrot.lane.b32.xlu1 %v1040_v31, %s2789_s25  ;;  %v2296_v32 = vmul.f32 -1.442695, %v1040_v31 }
 0x81d   :  { %2720 = vpow2.f32 %v2296_v32 }
 0x81e   :  { %2722 = vpow2.f32 %v2297_v33 }
 0x81f   :  { %1067 = vrot.lane.b32.xlu1 %v2501_v19, %s2789_s25 }
 0x827   :  { %v2721_v34 = vpop.eup %2720 }
 0x828   :  { %v1055_v35 = vadd.f32 1.0, %v2721_v34  ;;  %v2723_v37 = vpop.eup %2722 }
 0x829   :  { %v1056_v38 = vadd.f32 1.0, %v2723_v37 }
 0x82a   :  { %2724 = vrcp.f32 %v1055_v35 }
 0x82b   :  { %2726 = vrcp.f32 %v1056_v38 }
 0x834   :  { %v2725_v39 = vpop.eup %2724 }
 0x835   :  { %v1061_v40 = vmul.f32 %v2725_v39, %v1040_v31  ;;  %v2727_v41 = vpop.eup %2726 }
 0x836   :  { %v1062_v45 = vmul.f32 %v2727_v41, %v2501_v19 }
 0x88d   :  { %v1066_v42 = vpop.permute.xlu1 %1065 }
 0x88e   :  { %v1071_v44 = vmul.f32 %v1066_v42, %v1061_v40 }
 0x890   :  { %2518 = vmatprep.mubr.msk.f32.mxu0 %vm1081_vm9, %v1071_v44 }
 0x891   :  { %v1068_v46 = vpop.permute.xlu1 %1067 }
 0x892   :  { %v1072_v47 = vmul.f32 %v1068_v46, %v1062_v45 }
 0x894   :  { %2519 = vmatmul.mubr.msk.f32.vlgmr.msra.gmra.mrb[8].mxu0 %vm1081_vm9, %v1072_v47 }
 0x895   :  { %2544 = vmatprep.mubr.msk.f32.mxu0 %vm2785_vm1, %v2786_v9 }
 0x967   :  { %v3048_v48 = vpop.f32.mrb[8].mxu0 }
 0x968   :  { %v1154_v49 = vpop.f32.mrb[9].mxu0 }
 0x969   :  { %v3050_v51 = vadd.f32 %v1154_v49, %v962_v16 }
 0x96b   :  { %v1167_v52 = vmul.f32 %v3050_v51, %v3050_v51 }
 0x96d   :  { %v1168_v53 = vsel %vm97_vm0, %v1167_v52, 0.0 }
 0x96e   :  { %1169 = vadd.xlane.f32.xlu1 %v1168_v53 }
 0x9fb   :  { %v1170_v61 = vpop.xlane.xlu1 %1169 }
 0x9fc   :  { %v1171_v62 = vmul.f32 0.03125, %v1170_v61 }
 0x9fe   :  { %v1172_v63 = vadd.f32 1e-06, %v1171_v62 }
 0xa00   :  { %2728 = vrsqrt.f32 %v1172_v63 }
 0xa0a   :  { %v2729_v1 = vpop.eup %2728 }
 0xa0b   :  { %v1174_v3 = vmul.f32 %v2729_v1, %v3050_v51 }
 0xa0d   :  { %v1181_v4 = vmul.f32 %v2301_v2, %v1174_v3 }
 0xa0f   :  { %2530 = vmatmul.mubr.msk.f32.vlgmr.msra.gmra.mrb[14].mxu1 %vm97_vm0, %v1181_v4 }
 0xa10   :  { %2534 = vmatprep.mubr.msk.f32.mxu1 %vm2785_vm1, %v2786_v9 }
 0xae2   :  { %v3076_v5 = vpop.f32.mrb[14].mxu1 }
 0xae3   :  { %v1260_v7 = vmul.f32 %v3076_v5, %v2887_v18  ;;  %v2531_v8 = vpop.f32.mrb[15].mxu1 }
 0xae5   :  { %1262 = vrot.lane.b32.xlu1 %v1260_v7, %s2787_s23  ;;  %1266 = vrot.lane.b32.xlu0 %v1260_v7, %s2788_s24 }
 0xb57   :  { %v1263_v10 = vpop.permute.xlu1 %1262  ;;  %v1267_v11 = vpop.permute.xlu0 %1266 }
 0xb58   :  { %v1265_v12 = vadd.f32 %v1263_v10, %v1260_v7  ;;  %v1269_v13 = vadd.f32 %v1267_v11, %v1260_v7  ;;  %v2319_v10 = vld [vmem:[%s3234_s5 + $0x20] sm:$0xff]  ;;  %v2320_v11 = vld [vmem:[%s3234_s5 + $0x28] sm:$0xff] }
 0xb5a   :  { %1422 = vrot.lane.b32.xlu1 %v1265_v12, %s2788_s24  ;;  %1271 = vrot.lane.b32.xlu0 %v1269_v13, %s2789_s25 }
 0xb5e   :  { %1348 = vrot.lane.b32.xlu0 %v1265_v12, %s2790_s1 }
 0xb62   :  { %1424 = vrot.lane.b32.xlu0 %v1269_v13, %s2791_s26  ;;  %v2321_v13 = vld [vmem:[%s3234_s5 + $0x30] sm:$0xff] }
 0xb66   :  { %1500 = vrot.lane.b32.xlu0 %v1265_v12, %s2792_s27 }
 0xbcc   :  { %v1272_v18 = vpop.permute.xlu0 %1271  ;;  %v1423_v16 = vpop.permute.xlu1 %1422 }
 0xbcd   :  { %2533 = vmatpush3.xpose.msk.msra.mxu1 %vm203_vm2, %v1272_v18 }
 0xbce   :  { %2537 = vmatprep.subr.mxu1 %v2786_v9 }
 0xbd0   :  { %2535 = vmatmul.mubr.msk.f32.vlgmr.msra.gmra.mrb[16].mxu1 %vm203_vm2, %v1265_v12  ;;  %v1349_v14 = vpop.permute.xlu0 %1348  ;;  %v2656_v12 = vpack.c.bf16 %v2320_v11, %v2319_v10 }
 0xbd1   :  { %2538 = vmatpush3.xpose.msk.msra.mxu1 %vm203_vm2, %v1272_v18  ;;  %2539 = vmatprep.mubr.msk.f32.mxu1 %vm2785_vm1, %v2786_v9 }
 0xbd2   :  { %2547 = vmatprep.subr.mxu1 %v2786_v9 }
 0xbd4   :  { %2540 = vmatmul.mubr.msk.f32.vlgmr.msra.gmra.mrb[18].mxu1 %vm203_vm2, %v1349_v14  ;;  %v1425_v15 = vpop.permute.xlu0 %1424 }
 0xbd5   :  { %2543 = vmatpush3.xpose.msk.msra.mxu0 %vm203_vm2, %v1425_v15  ;;  %2548 = vmatpush3.xpose.msk.msra.mxu1 %vm203_vm2, %v1425_v15 }
 0xbd6   :  { %2549 = vmatprep.mubr.msk.f32.mxu1 %vm2785_vm1, %v2786_v9  ;;  %2552 = vmatprep.subr.mxu0 %v2786_v9 }
 0xbd7   :  { %2557 = vmatprep.subr.mxu1 %v2786_v9 }
 0xbd8   :  { %2545 = vmatmul.mubr.msk.f32.vlgmr.msra.gmra.mrb[10].mxu0 %vm203_vm2, %v1423_v16  ;;  %v1501_v20 = vpop.permute.xlu0 %1500 }
 0xbd9   :  { %2550 = vmatmul.mubr.msk.f32.vlgmr.msra.gmra.mrb[20].mxu1 %vm203_vm2, %v1501_v20  ;;  %2554 = vmatprep.mubr.msk.f32.mxu0 %vm2785_vm1, %v2786_v9 }
 0xbda   :  { %2559 = vmatprep.mubr.msk.f32.mxu1 %vm2785_vm1, %v2786_v9 }
 0xca3   :  { %v1344_v21 = vpop.f32.mrb[16].mxu1 }
 0xca4   :  { %v1574_v0 = vsel %vm2920_vm3, %v1344_v21, -1e+30  ;;  %v2536_v22 = vpop.f32.mrb[17].mxu1 }
 0xca5   :  { %v1578_v23 = vsel %vm203_vm2, %v1574_v0, -inf }
 0xca6   :  { %1579 = vmax.xlane.f32.xlu1 %v1578_v23 }
 0xca7   :  { %v1418_v24 = vpop.f32.mrb[18].mxu1 }
 0xca8   :  { %v1575_v25 = vsel %vm2927_vm4, %v1418_v24, -1e+30  ;;  %v2541_v26 = vpop.f32.mrb[19].mxu1 }
 0xca9   :  { %v1581_v27 = vsel %vm203_vm2, %v1575_v25, -inf }
 0xcaa   :  { %1582 = vmax.xlane.f32.xlu0 %v1581_v27 }
 0xcab   :  { %v1496_v28 = vpop.f32.mrb[10].mxu0 }
 0xcac   :  { %v1576_v29 = vsel %vm2934_vm5, %v1496_v28, -1e+30  ;;  %v2546_v30 = vpop.f32.mrb[11].mxu0  ;;  %v1570_v19 = vpop.f32.mrb[20].mxu1 }
 0xcad   :  { %v1577_v36 = vsel %vm2941_vm6, %v1570_v19, -1e+30  ;;  %v2551_v31 = vpop.f32.mrb[21].mxu1  ;;  %v1584_v32 = vsel %vm203_vm2, %v1576_v29, -inf }
 0xcae   :  { %1585 = vmax.xlane.f32.xlu0 %v1584_v32  ;;  %v1587_v43 = vsel %vm203_vm2, %v1577_v36, -inf  ;;  %v2326_v31 = vld [vmem:[%s3235_s6 + $0x20] sm:$0xff]  ;;  %v2327_v32 = vld [vmem:[%s3235_s6 + $0x28] sm:$0xff] }
 0xcaf   :  { %1588 = vmax.xlane.f32.xlu1 %v1587_v43  ;;  %v2328_v43 = vld [vmem:[%s3235_s6 + $0x30] sm:$0xff] }
 0xd33   :  { %v1580_v33 = vpop.xlane.xlu1 %1579 }
 0xd34   :  { %v1590_v34 = vsub.f32 %v1574_v0, %v1580_v33  ;;  %v2661_v33 = vpack.c.bf16 %v2327_v32, %v2326_v31 }
 0xd36   :  { %v1594_v35 = vmul.f32 1.442695, %v1590_v34  ;;  %v2329_v34 = vld [vmem:[%s3235_s6 + $0x38] sm:$0xff] }
 0xd37   :  { %v1583_v37 = vpop.xlane.xlu0 %1582 }
 0xd38   :  { %2730 = vpow2.f32 %v1594_v35  ;;  %v1591_v38 = vsub.f32 %v1575_v25, %v1583_v37  ;;  %v2665_v35 = vpack.c.bf16 %v2329_v34, %v2328_v43 }
 0xd3a   :  { %v1596_v50 = vmul.f32 1.442695, %v1591_v38 }
 0xd3b   :  { %v1586_v39 = vpop.xlane.xlu0 %1585 }
 0xd3c   :  { %2732 = vpow2.f32 %v1596_v50  ;;  %v1592_v40 = vsub.f32 %v1576_v29, %v1586_v39  ;;  %v1589_v41 = vpop.xlane.xlu1 %1588 }
 0xd3d   :  { %v1593_v56 = vsub.f32 %v1577_v36, %v1589_v41 }
 0xd3e   :  { %v1598_v42 = vmul.f32 1.442695, %v1592_v40  ;;  %v2325_v40 = vld [vmem:[%s3232_s3 + $0x1] ss:$0 sm:$0xff] }
 0xd3f   :  { %v1600_v44 = vmul.f32 1.442695, %v1593_v56  ;;  %v1164_v56 = vadd.f32 %v3048_v48, %v3010_v17  ;;  %v2336_v17 = vld [vmem:[%s3236_s7 + $0x50] sm:$0xff] }
 0xd40   :  { %2734 = vpow2.f32 %v1598_v42 }
 0xd41   :  { %2736 = vpow2.f32 %v1600_v44 }
 0xd42   :  { %v2731_v45 = vpop.eup %2730 }
 0xd43   :  { %v1602_v46 = vsel %vm203_vm2, %v2731_v45, 0.0 }
 0xd44   :  { %1603 = vadd.xlane.f32.xlu0 %v1602_v46  ;;  %v2334_v46 = vld [vmem:[%s3236_s7 + $0x40] sm:$0xff] }
 0xd46   :  { %v2733_v47 = vpop.eup %2732 }
 0xd47   :  { %v1605_v49 = vsel %vm203_vm2, %v2733_v47, 0.0 }
 0xd48   :  { %1606 = vadd.xlane.f32.xlu1 %v1605_v49 }
 0xd4a   :  { %v2735_v52 = vpop.eup %2734 }
 0xd4b   :  { %v2737_v53 = vpop.eup %2736  ;;  %v1608_v54 = vsel %vm203_vm2, %v2735_v52, 0.0 }
 0xd4c   :  { %1609 = vadd.xlane.f32.xlu0 %v1608_v54  ;;  %v1611_v55 = vsel %vm203_vm2, %v2737_v53, 0.0 }
 0xd4d   :  { %1612 = vadd.xlane.f32.xlu1 %v1611_v55  ;;  %v2340_v55 = vld [vmem:[%s3236_s7 + $0x70] sm:$0xff] }
 0xd5e   :  { %1772 = vrot.lane.b32.xlu1 %v3076_v5, %s2793_s28 }
 0xd62   :  { %1623 = vrot.lane.b32.xlu0 %v3076_v5, %s2794_s29 }
 0xdd1   :  { %v1604_v57 = vpop.xlane.xlu0 %1603 }
 0xdd2   :  { %2738 = vrcp.f32 %v1604_v57  ;;  %v2341_v57 = vld [vmem:[%s3236_s7 + $0x78] sm:$0xff] }
 0xdd5   :  { %v1607_v58 = vpop.xlane.xlu1 %1606 }
 0xdd6   :  { %2740 = vrcp.f32 %v1607_v58  ;;  %v2681_v58 = vpack.c.bf16 %v2341_v57, %v2340_v55 }
 0xdd9   :  { %v1610_v59 = vpop.xlane.xlu0 %1609 }
 0xdda   :  { %2742 = vrcp.f32 %v1610_v59  ;;  %v1613_v60 = vpop.xlane.xlu1 %1612 }
 0xddb   :  { %2744 = vrcp.f32 %v1613_v60 }
 0xddc   :  { %v2739_v61 = vpop.eup %2738 }
 0xddd   :  { %v1615_v62 = vmul.f32 %v2739_v61, %v2731_v45  ;;  %v1624_v63 = vpop.permute.xlu0 %1623 }
 0xdde   :  { %2553 = vmatpush3.msra.mxu0 %v1624_v63  ;;  %2558 = vmatpush3.msra.mxu1 %v1624_v63  ;;  %v1773_v1 = vpop.permute.xlu1 %1772 }
 0xddf   :  { %2555 = vmatmul.mubr.msk.f32.vlgmr.msra.gmra.mrb[12].mxu0 %vm203_vm2, %v1615_v62  ;;  %2562 = vmatprep.subr.mxu0 %v2786_v9 }
 0xde0   :  { %v2741_v2 = vpop.eup %2740  ;;  %2563 = vmatpush3.msra.mxu0 %v1773_v1  ;;  %2567 = vmatprep.subr.mxu1 %v2786_v9 }
 0xde1   :  { %v1617_v3 = vmul.f32 %v2741_v2, %v2733_v47  ;;  %2564 = vmatprep.mubr.msk.f32.mxu0 %vm2785_vm1, %v2786_v9  ;;  %2655 = vmatprep.subr.bf16.mxu0 %v2784_v6  ;;  %v2335_v47 = vld [vmem:[%s3236_s7 + $0x48] sm:$0xff] }
 0xde2   :  { %v2669_v48 = vpack.c.bf16 %v2335_v47, %v2334_v46 }
 0xde3   :  { %2560 = vmatmul.mubr.msk.f32.vlgmr.msra.gmra.mrb[22].mxu1 %vm203_vm2, %v1617_v3 }
 0xde4   :  { %v2743_v4 = vpop.eup %2742  ;;  %2568 = vmatpush3.msra.mxu1 %v1773_v1  ;;  %2569 = vmatprep.mubr.msk.f32.mxu1 %vm2785_vm1, %v2786_v9 }
 0xde5   :  { %v2745_v5 = vpop.eup %2744  ;;  %v1619_v7 = vmul.f32 %v2743_v4, %v2735_v52  ;;  %2662 = vmatprep.subr.bf16.mxu1 %v2661_v33  ;;  %v2338_v52 = vld [vmem:[%s3236_s7 + $0x60] sm:$0xff] }
 0xde6   :  { %v1621_v8 = vmul.f32 %v2745_v5, %v2737_v53  ;;  %v2339_v53 = vld [vmem:[%s3236_s7 + $0x68] sm:$0xff] }
 0xde7   :  { %2565 = vmatmul.mubr.msk.f32.vlgmr.msra.gmra.mrb[14].mxu0 %vm203_vm2, %v1619_v7  ;;  %v2677_v54 = vpack.c.bf16 %v2339_v53, %v2338_v52 }
 0xde8   :  { %2570 = vmatmul.mubr.msk.f32.vlgmr.msra.gmra.mrb[24].mxu1 %vm203_vm2, %v1621_v8  ;;  %2580 = vmatprep.mubr.msk.f32.mxu0 %vm2785_vm1, %v2786_v9  ;;  %v2322_v9 = vld [vmem:[%s3234_s5 + $0x38] sm:$0xff]  ;;  %s2797_s5 = smov [#allocation2]  }
 0xde9   :  { %2657 = vmatpush3.bf16.msra.mxu0 %v2656_v12  ;;  %v2659_v18 = vpack.c.bf16 %v2322_v9, %v2321_v13  ;;  %2664 = vmatpush3.bf16.msra.mxu1 %v2661_v33 }
 0xdea   :  { %2658 = vmatprep.subr.bf16.mxu0 %v2784_v6  ;;  %2666 = vmatprep.subr.bf16.mxu1 %v2665_v35 }
 0xded   :  { %2660 = vmatpush3.bf16.msra.mxu0 %v2659_v18  ;;  %2668 = vmatpush3.bf16.msra.mxu1 %v2665_v35 }
 0xdee   :  { %2670 = vmatprep.subr.bf16.mxu0 %v2669_v48 }
 0xeb2   :  { %v1695_v14 = vpop.f32.mrb[12].mxu0 }
 0xeb3   :  { %v2556_v15 = vpop.f32.mrb[13].mxu0 }
 0xeb6   :  { %v1768_v16 = vpop.f32.mrb[22].mxu1 }
 0xeb7   :  { %1922 = vrot.lane.b32.xlu1 %v1768_v16, %s2795_s17  ;;  %v2561_v20 = vpop.f32.mrb[23].mxu1 }
 0xeba   :  { %v1844_v21 = vpop.f32.mrb[14].mxu0 }
 0xebb   :  { %1926 = vrot.lane.b32.xlu0 %v1844_v21, %s2796_s18  ;;  %v2566_v6 = vpop.f32.mrb[15].mxu0  ;;  %v1917_v0 = vpop.f32.mrb[24].mxu1 }
 0xebc   :  { %1930 = vrot.lane.b32.xlu1 %v1917_v0, %s2793_s28  ;;  %v2571_v22 = vpop.f32.mrb[25].mxu1  ;;  %s2267_s28 = sshll.u32 %s2797_s5, 4  ;;  %s2268_s28 = int_to_ptr.vmem [resolvable:$true] %s2267_s28 }
 0xebd   :  { %s2760_s18 = scalar_lea.vmem %s2268_s28, 256  ;;  %p2765_p1 = scmp.lt.s32.totalorder %s2268_s28, %s2268_s28 }
 0xebe   :  { %p2761_p0 = scmp.ne.s32.totalorder %s2268_s28, %s2760_s18  ;;  %p2766_p2 = scmp.lt.s32.totalorder %s2760_s18, %s2760_s18 }
 0xec0   :  { %p2767_p3 = por %p2766_p2, %p2765_p1 }
 0xec2   :  { %p2768_p4 = pnand %p2767_p3, %p2761_p0 }
 0xf29   :  { %v1923_v23 = vpop.permute.xlu1 %1922 }
 0xf2a   :  { %v1933_v24 = vsel %vm203_vm2, %v1695_v14, %v1923_v23 }
 0xf2d   :  { %v1927_v25 = vpop.permute.xlu0 %1926 }
 0xf2e   :  { %v1934_v26 = vsel %vm865_vm7, %v1933_v24, %v1927_v25  ;;  %v1931_v27 = vpop.permute.xlu1 %1930 }
 0xf2f   :  { %v1935_v28 = vsel %vm867_vm8, %v1934_v26, %v1931_v27 }
 0xf30   :  { %2581 = vmatmul.mubr.msk.f32.vlgmr.msra.gmra.mrb[16].mxu0 %vm97_vm0, %v1935_v28  ;;  %v2344_v28 = vld [vmem:[%s3237_s8] ss:$0 sm:$0xff] }
 0xf31   :  { %2672 = vmatpush3.bf16.msra.mxu0 %v2669_v48 }
0x1003   :  { %v2010_v29 = vpop.f32.mrb[16].mxu0 }
0x1004   :  { %v2016_v30 = vmul.f32 %v2010_v29, %v2010_v29  ;;  %v2582_v19 = vpop.f32.mrb[17].mxu0 }
0x1006   :  { %v2017_v36 = vsel %vm97_vm0, %v2016_v30, 0.0 }
0x1007   :  { %2018 = vadd.xlane.f32.xlu0 %v2017_v36 }
0x1094   :  { %v2019_v37 = vpop.xlane.xlu0 %2018 }
0x1095   :  { %v2020_v38 = vmul.f32 0.03125, %v2019_v37 }
0x1097   :  { %v2021_v50 = vadd.f32 1e-06, %v2020_v38 }
0x1099   :  { %2746 = vrsqrt.f32 %v2021_v50 }
0x10a3   :  { %v2747_v39 = vpop.eup %2746 }
0x10a4   :  { %v2023_v41 = vmul.f32 %v2747_v39, %v2010_v29 }
0x10a6   :  { %v2030_v42 = vmul.f32 %v2325_v40, %v2023_v41 }
0x10a8   :  { %v2031_v44 = vadd.f32 %v2030_v42, %v3050_v51  ;;  %v2032_v45 = vadd.f32 %v2030_v42, %v1164_v56  ;;  %v2337_v51 = vld [vmem:[%s3236_s7 + $0x58] sm:$0xff] }
0x10a9   :  { %v2673_v49 = vpack.c.bf16 %v2337_v51, %v2336_v17 }
0x10aa   :  { %2591 = vmatprep.mubr.msk.f32.mxu1 %vm97_vm0, %v2031_v44 }
0x10ab   :  { %2592 = vmatmul.mubr.msk.f32.vlgmr.msra.gmra.mrb[26].mxu1 %vm97_vm0, %v2032_v45  ;;  %2674 = vmatprep.subr.bf16.mxu0 %v2673_v49 }
0x10ac   :  { %2676 = vmatpush3.bf16.msra.mxu0 %v2673_v49 }
0x10ad   :  { %2678 = vmatprep.subr.bf16.mxu0 %v2677_v54 }
0x10b0   :  { %2680 = vmatpush3.bf16.msra.mxu0 %v2677_v54 }
0x10b1   :  { %2682 = vmatprep.subr.bf16.mxu0 %v2681_v58 }
0x10b4   :  { %2684 = vmatpush3.bf16.msra.mxu0 %v2681_v58 }
0x117e   :  { %v2593_v59 = vpop.f32.mrb[26].mxu1 }
0x117f   :  { %v2110_v60 = vpop.f32.mrb[27].mxu1  ;;  %v2333_v62 = vmul.f32 -1.442695, %v2593_v59 }
0x1180   :  { %2135 = vrot.lane.b32.xlu1 %v2110_v60, %s2789_s25  ;;  %v2332_v61 = vmul.f32 -1.442695, %v2110_v60 }
0x1182   :  { %2748 = vpow2.f32 %v2332_v61 }
0x1183   :  { %2750 = vpow2.f32 %v2333_v62 }
0x1184   :  { %2137 = vrot.lane.b32.xlu1 %v2593_v59, %s2789_s25 }
0x118c   :  { %v2749_v63 = vpop.eup %2748 }
0x118d   :  { %v2125_v1 = vadd.f32 1.0, %v2749_v63  ;;  %v2751_v2 = vpop.eup %2750 }
0x118e   :  { %v2126_v3 = vadd.f32 1.0, %v2751_v2 }
0x118f   :  { %2752 = vrcp.f32 %v2125_v1 }
0x1190   :  { %2754 = vrcp.f32 %v2126_v3 }
0x1199   :  { %v2753_v4 = vpop.eup %2752 }
0x119a   :  { %v2131_v5 = vmul.f32 %v2753_v4, %v2110_v60  ;;  %v2755_v7 = vpop.eup %2754 }
0x119b   :  { %v2132_v11 = vmul.f32 %v2755_v7, %v2593_v59 }
0x11f2   :  { %v2136_v8 = vpop.permute.xlu1 %2135 }
0x11f3   :  { %v2141_v10 = vmul.f32 %v2136_v8, %v2131_v5 }
0x11f5   :  { %2610 = vmatprep.mubr.msk.f32.mxu0 %vm1081_vm9, %v2141_v10 }
0x11f6   :  { %v2138_v12 = vpop.permute.xlu1 %2137 }
0x11f7   :  { %v2142_v13 = vmul.f32 %v2138_v12, %v2132_v11 }
0x11f9   :  { %2611 = vmatmul.mubr.msk.f32.vlgmr.msra.gmra.mrb[18].mxu0 %vm1081_vm9, %v2142_v13 }
0x12cc   :  { %v2612_v9 = vpop.f32.mrb[18].mxu0 }
0x12cd   :  { %v2234_v18 = vadd.f32 %v2612_v9, %v2032_v45  ;;  %v2224_v14 = vpop.f32.mrb[19].mxu0 }
0x12ce   :  { %v2233_v15 = vadd.f32 %v2224_v14, %v2031_v44 }
0x12cf   :  { %v2237_v16 = vmul.f32 %v2234_v18, %v2234_v18 }
0x12d0   :  { %v2236_v20 = vmul.f32 %v2233_v15, %v2233_v15 }
0x12d1   :  { %v2241_v21 = vsel %vm97_vm0, %v2237_v16, 0.0 }
0x12d2   :  { %2242 = vadd.xlane.f32.xlu0 %v2241_v21  ;;  %v2238_v6 = vsel %vm97_vm0, %v2236_v20, 0.0 }
0x12d3   :  { %2239 = vadd.xlane.f32.xlu1 %v2238_v6 }
0x135f   :  { %v2243_v0 = vpop.xlane.xlu0 %2242 }
0x1360   :  { %v2245_v22 = vmul.f32 0.03125, %v2243_v0  ;;  %v2240_v23 = vpop.xlane.xlu1 %2239 }
0x1361   :  { %v2244_v24 = vmul.f32 0.03125, %v2240_v23 }
0x1362   :  { %v2247_v25 = vadd.f32 1e-06, %v2245_v22 }
0x1363   :  { %v2246_v26 = vadd.f32 1e-06, %v2244_v24 }
0x1364   :  { %2756 = vrsqrt.f32 %v2247_v25 }
0x1365   :  { %2758 = vrsqrt.f32 %v2246_v26 }
0x136e   :  { %v2757_v27 = vpop.eup %2756 }
0x136f   :  { %v2759_v29 = vpop.eup %2758  ;;  %v2251_v30 = vmul.f32 %v2757_v27, %v2234_v18 }
0x1370   :  { %v2250_v19 = vmul.f32 %v2759_v29, %v2233_v15 }
0x1371   :  { %v2259_v36 = vmul.f32 %v2344_v28, %v2251_v30 }
0x1372   :  { %v2258_v31 = vmul.f32 %v2344_v28, %v2250_v19 }
0x1373   :  { %2261 = vst.msk [vmem:[#allocation2 + $0x8] sm:$0xff] %vm97_vm0, %v2259_v36 }
0x1374   :  { %2260 = vst.msk [vmem:[#allocation2] sm:$0xff] %vm97_vm0, %v2258_v31 }
0x1375   :  { %2771 = shalt.err (!%p2768_p4)
}
0x1376   :  { %s2772_s20 = scalar_lea.hbm %s3238_s9, 256 }
0x1377   :  { %p2773_p5 = scmp.ne.s32.totalorder %s3238_s9, %s2772_s20  ;;  %p2776_p6 = scmp.lt.u32.totalorder %s2772_s20, %s3238_s9 }
0x1379   :  { %p2778_p7 = pnand %p2776_p6, %p2773_p5 }
0x137b   :  { %2781 = shalt.err (!%p2778_p7)
}
0x137c   :  { %s2798_s10 = smov 128  }
0x137d   :  { %2273 = dma.vmem_to_hbm [thread:$0]  %s2268_s28, 256, %s3238_s9, [#allocation3], %s2798_s10, %s2798_s10, %s2795_s17  }
0x137e   :  { %2782 = dma.done.wait [#allocation3], 256  }
0x137f   :  { %2783 = vsyncadd [#allocation3], 4294967040 }
0x1380   :  { %2277 = vsyncpa [#allocation3], 1 }

</bundles_post_ra>
